<compile_context>
chip_gen: v6e
topology: v6e:2x2x1
jax: 0.10.0
libtpu: 0.0.40
codegen_flags: <defaults>
</compile_context>

<pallas_src>
import numpy as np
import jax
import jax.numpy as jnp
from jax import lax
from jax.experimental import pallas as pl
from jax.experimental.pallas import tpu as pltpu


_C1 = 0.01 ** 2
_C2 = 0.03 ** 2


# ----------------------------------------------------------------------------
# Gaussian window (same construction as pytorch-ssim's create_window)
# ----------------------------------------------------------------------------
def _gaussian_1d(window_size=11, sigma=1.5):
    xs = np.arange(window_size, dtype=np.float64)
    g = np.exp(-((xs - window_size // 2) ** 2) / (2.0 * sigma ** 2))
    return (g / g.sum()).astype(np.float32)


def _banded_blur_matrix(size, window_size=11, sigma=1.5):
    """M[i, k] = g[k - i + w//2] for |k - i| <= w//2, else 0.

    (Gh @ X) / (X @ Gw) apply the 1-D Gaussian along rows / cols with zero
    padding, exactly as F.conv2d(..., padding=w//2) does for the separable
    2-D window.  M is symmetric.
    """
    g = _gaussian_1d(window_size, sigma)
    half = window_size // 2
    m = np.zeros((size, size), dtype=np.float32)
    for i in range(size):
        for k in range(max(0, i - half), min(size, i + half + 1)):
            m[i, k] = g[k - i + half]
    return m


def _round_up(x, m):
    return ((x + m - 1) // m) * m


def _vmem_capacity_bytes():
    try:
        return int(pltpu.get_tpu_info().vmem_capacity_bytes)
    except Exception:
        return 64 * 1024 * 1024          # conservative fallback (v7x per-TC)


def _pick_plane_batch(nc, hp, wp, itemsize, budget_bytes, max_b=8):
    """Largest divisor b of nc (capped) whose per-step working set fits budget.

    Keeps g = nc // b >= 2 whenever possible so the "parallel" grid axis can
    be sharded across both v7x TensorCores.  Returns (b, estimated_bytes).
    """
    # gh/gw double-buffered + ~14 live f32 maps for one plane's blur/SSIM chain
    fixed = 2 * (hp * hp + wp * wp) * 4 + 14 * hp * wp * 4
    per_plane = hp * wp * 2 * 2 * itemsize       # double-buffered pred+target
    best = 1
    for d in range(1, min(nc, max_b) + 1):
        if nc % d:
            continue
        if nc >= 2 and nc // d < 2:
            continue                             # preserve g >= 2 (v7x megacore)
        if fixed + d * per_plane <= budget_bytes:
            best = d
    est = fixed + best * per_plane
    return best, est


# ----------------------------------------------------------------------------
# Pallas kernel
# ----------------------------------------------------------------------------
def _make_kernel(b, hp, wp, h_valid):
    need_row_mask = hp != h_valid

    def kernel(p_ref, t_ref, gh_ref, gw_ref, l1_out_ref, ssim_out_ref):
        gh = gh_ref[...]                 # (hp, hp) banded Gaussian (rows)
        gw = gw_ref[...]                 # (wp, wp) banded Gaussian (cols)

        if need_row_mask:
            rows = lax.broadcasted_iota(jnp.int32, (hp, wp), 0)
            row_mask = (rows < h_valid).astype(jnp.float32)

        def blur(z):
            # zero-padded "same" separable 11x11 Gaussian as two 2-D MXU matmuls
            zw = jnp.dot(z, gw, preferred_element_type=jnp.float32)
            return jnp.dot(gh, zw, preferred_element_type=jnp.float32)

        l1_acc = jnp.zeros((1, wp), jnp.float32)
        ssim_acc = jnp.zeros((1, wp), jnp.float32)

        # Static loop over the b planes of this grid step (b is capped small);
        # each plane's temporaries are consumed by the accumulates below.
        for p in range(b):
            x = p_ref[p].astype(jnp.float32)     # (hp, wp)
            y = t_ref[p].astype(jnp.float32)

            l1_acc = l1_acc + jnp.sum(jnp.abs(x - y), axis=0, keepdims=True)

            mu1 = blur(x)
            mu2 = blur(y)
            exx = blur(x * x)
            eyy = blur(y * y)
            exy = blur(x * y)

            mu1_sq = mu1 * mu1
            mu2_sq = mu2 * mu2
            mu1_mu2 = mu1 * mu2
            sigma1_sq = exx - mu1_sq
            sigma2_sq = eyy - mu2_sq
            sigma12 = exy - mu1_mu2

            num = (2.0 * mu1_mu2 + _C1) * (2.0 * sigma12 + _C2)
            den = (mu1_sq + mu2_sq + _C1) * (sigma1_sq + sigma2_sq + _C2)
            # EUP approximate reciprocal + one Newton step (~f32 exact).
            r = pl.reciprocal(den, approx=True)
            r = r * (2.0 - den * r)
            ssim_map = num * r
            if need_row_mask:
                ssim_map = ssim_map * row_mask
            ssim_acc = ssim_acc + jnp.sum(ssim_map, axis=0, keepdims=True)

        # Lane-partial sums only; the cross-lane reduce and the alpha/weight
        # combine happen on two tiny arrays in plain JAX.
        l1_out_ref[...] = l1_acc.reshape(1, 1, wp)
        ssim_out_ref[...] = ssim_acc.reshape(1, 1, wp)

    return kernel


def l1_ssim_loss(pred, target, *, l1_weight=1.0, ssim_weight=1.0,
                 alpha=0.3, window_size=11, sigma=1.5):
    """total = alpha * l1_weight * mean|p-t|
             + (1 - alpha) * ssim_weight * (1 - SSIM(p, t))    (scalar, f32)."""
    assert pred.shape == target.shape and pred.ndim == 4
    n, c, h, w = pred.shape
    nc = n * c
    itemsize = np.dtype(pred.dtype).itemsize

    # Sublane/lane alignment: tile-aligned slices, lane-dense matmuls/stores.
    hp = _round_up(h, 8 if itemsize >= 4 else 16)
    wp = _round_up(w, 128)

    # Stream the original dtype (no wrapper upcast); all math is f32 in-kernel.
    p = pred.reshape(nc, h, w)
    t = target.reshape(nc, h, w)
    if (hp, wp) != (h, w):
        pad = ((0, 0), (0, hp - h), (0, wp - w))
        p = jnp.pad(p, pad)
        t = jnp.pad(t, pad)

    gh = jnp.asarray(_banded_blur_matrix(hp, window_size, sigma))
    gw = jnp.asarray(_banded_blur_matrix(wp, window_size, sigma))

    cap = _vmem_capacity_bytes()
    budget = min(int(cap * 0.55), 96 * 1024 * 1024)
    b, est = _pick_plane_batch(nc, hp, wp, itemsize, budget)
    g = nc // b
    vmem_limit = int(min(cap * 0.8, max(2 * est, 32 * 1024 * 1024)))

    kernel = _make_kernel(b, hp, wp, h)

    l1_parts, ssim_parts = pl.pallas_call(
        kernel,
        out_shape=(jax.ShapeDtypeStruct((g, 1, wp), jnp.float32),
                   jax.ShapeDtypeStruct((g, 1, wp), jnp.float32)),
        grid_spec=pltpu.PrefetchScalarGridSpec(
            num_scalar_prefetch=0,
            grid=(g,),
            in_specs=[
                pl.BlockSpec((b, hp, wp), lambda i: (i, 0, 0)),
                pl.BlockSpec((b, hp, wp), lambda i: (i, 0, 0)),
                # constant-index blocks: fetched once by the pipeline
                pl.BlockSpec((hp, hp), lambda i: (0, 0)),
                pl.BlockSpec((wp, wp), lambda i: (0, 0)),
            ],
            out_specs=[
                pl.BlockSpec((1, 1, wp), lambda i: (i, 0, 0)),
                pl.BlockSpec((1, 1, wp), lambda i: (i, 0, 0)),
            ],
        ),
        compiler_params=pltpu.CompilerParams(
            dimension_semantics=("parallel",),
            vmem_limit_bytes=vmem_limit),
    )(p, t, gh, gw)

    count = jnp.float32(n * c * h * w)
    # Padded lanes (cols >= w) are dropped here; padded rows were masked
    # inside the kernel.  L1 padding contributes exactly zero.
    l1_mean = jnp.sum(l1_parts[..., :w]) / count
    ssim_mean = jnp.sum(ssim_parts[..., :w]) / count
    return (alpha * (l1_weight * l1_mean)
            + (1.0 - alpha) * ssim_weight * (1.0 - ssim_mean))


# ----------------------------------------------------------------------------
# Pure-JAX reference (mirrors the PyTorch module) for a sanity check
# ----------------------------------------------------------------------------
def _reference(pred, target, *, l1_weight=1.0, ssim_weight=1.0, alpha=0.3,
               window_size=11, sigma=1.5):
    n, c, h, w = pred.shape
    gh = jnp.asarray(_banded_blur_matrix(h, window_size, sigma))
    gw = jnp.asarray(_banded_blur_matrix(w, window_size, sigma))

    def blur(z):  # z: (N, C, H, W)
        return jnp.einsum('ij,ncjk,kl->ncil', gh, z, gw)

    x = pred.astype(jnp.float32)
    y = target.astype(jnp.float32)
    mu1, mu2 = blur(x), blur(y)
    mu1_sq, mu2_sq, mu1_mu2 = mu1 * mu1, mu2 * mu2, mu1 * mu2
    s1 = blur(x * x) - mu1_sq
    s2 = blur(y * y) - mu2_sq
    s12 = blur(x * y) - mu1_mu2
    ssim_map = ((2 * mu1_mu2 + _C1) * (2 * s12 + _C2)) / (
        (mu1_sq + mu2_sq + _C1) * (s1 + s2 + _C2))
    ssim = jnp.mean(ssim_map)
    l1 = l1_weight * jnp.mean(jnp.abs(x - y))
    return alpha * l1 + (1 - alpha) * ssim_weight * (1 - ssim)


if __name__ == "__main__":
    key = jax.random.PRNGKey(0)
    k1, k2 = jax.random.split(key)
    N, C, H, W = 2, 4, 16, 16
    pred = jax.random.uniform(k1, (N, C, H, W), dtype=jnp.float32)
    target = jax.random.uniform(k2, (N, C, H, W), dtype=jnp.float32)

    out = jax.block_until_ready(l1_ssim_loss(pred, target))
    ref = jax.block_until_ready(_reference(pred, target))

    assert np.allclose(np.asarray(out), np.asarray(ref), rtol=2e-4, atol=1e-5), \
        (float(out), float(ref))

    print("KERNEL_OK")
</pallas_src>

<mosaic_0001>
module attributes {stable_mosaic.version = 11 : i64} {
  func.func @kernel(%arg0: i32, %arg1: memref<4x16x128xf32, #tpu.memory_space<vmem>>, %arg2: memref<4x16x128xf32, #tpu.memory_space<vmem>>, %arg3: memref<16x16xf32, #tpu.memory_space<vmem>>, %arg4: memref<128x128xf32, #tpu.memory_space<vmem>>, %arg5: memref<1x1x128xf32, #tpu.memory_space<vmem>>, %arg6: memref<1x1x128xf32, #tpu.memory_space<vmem>>) attributes {dimension_semantics = [#tpu.dimension_semantics<parallel>], iteration_bounds = array<i64: 2>, scalar_prefetch = 0 : i64, scratch_operands = 0 : i64, tpu.core_type = #tpu.core_type<tc>, window_params = [{transform_indices = @transform_0, window_bounds = array<i64: 4, 16, 128>}, {transform_indices = @transform_1, window_bounds = array<i64: 4, 16, 128>}, {pipeline_mode = #tpu.pipeline_mode<synchronous>, transform_indices = @transform_2, window_bounds = array<i64: 16, 16>}, {pipeline_mode = #tpu.pipeline_mode<synchronous>, transform_indices = @transform_3, window_bounds = array<i64: 128, 128>}, {transform_indices = @transform_4, window_bounds = array<i64: 1, 1, 128>}, {transform_indices = @transform_5, window_bounds = array<i64: 1, 1, 128>}]} {
    %c0 = arith.constant 0 : index
    %c0_0 = arith.constant 0 : index
    %0 = vector.load %arg3[%c0, %c0_0] : memref<16x16xf32, #tpu.memory_space<vmem>>, vector<16x16xf32>
    %c0_1 = arith.constant 0 : index
    %c0_2 = arith.constant 0 : index
    %1 = vector.load %arg4[%c0_1, %c0_2] : memref<128x128xf32, #tpu.memory_space<vmem>>, vector<128x128xf32>
    %cst = arith.constant 0.000000e+00 : f32
    %2 = vector.broadcast %cst : f32 to vector<1x128xf32>
    %cst_3 = arith.constant 0.000000e+00 : f32
    %3 = vector.broadcast %cst_3 : f32 to vector<1x128xf32>
    %c0_4 = arith.constant 0 : index
    %c0_5 = arith.constant 0 : index
    %c0_6 = arith.constant 0 : index
    %4 = vector.load %arg1[%c0_4, %c0_5, %c0_6] : memref<4x16x128xf32, #tpu.memory_space<vmem>>, vector<1x16x128xf32>
    %5 = vector.shape_cast %4 : vector<1x16x128xf32> to vector<16x128xf32>
    %c0_7 = arith.constant 0 : index
    %c0_8 = arith.constant 0 : index
    %c0_9 = arith.constant 0 : index
    %6 = vector.load %arg2[%c0_7, %c0_8, %c0_9] : memref<4x16x128xf32, #tpu.memory_space<vmem>>, vector<1x16x128xf32>
    %7 = vector.shape_cast %6 : vector<1x16x128xf32> to vector<16x128xf32>
    %8 = arith.subf %5, %7 : vector<16x128xf32>
    %9 = math.absf %8 : vector<16x128xf32>
    %cst_10 = arith.constant dense<0.000000e+00> : vector<128xf32>
    %10 = vector.multi_reduction <add>, %9, %cst_10 [0] : vector<16x128xf32> to vector<128xf32>
    %11 = vector.shape_cast %10 : vector<128xf32> to vector<1x128xf32>
    %12 = arith.addf %2, %11 : vector<1x128xf32>
    %cst_11 = arith.constant dense<0.000000e+00> : vector<16x128xf32>
    %13 = tpu.matmul %5, %1, %cst_11 {dimension_numbers = #tpu.dot_dimension_numbers<[1], [0], [0], [1], [0, 0, 1, 1], [], []>} : vector<16x128xf32>, vector<128x128xf32>, vector<16x128xf32> -> vector<16x128xf32>
    %cst_12 = arith.constant dense<0.000000e+00> : vector<16x128xf32>
    %14 = tpu.matmul %0, %13, %cst_12 {dimension_numbers = #tpu.dot_dimension_numbers<[1], [0], [0], [1], [0, 0, 1, 1], [], []>} : vector<16x16xf32>, vector<16x128xf32>, vector<16x128xf32> -> vector<16x128xf32>
    %cst_13 = arith.constant dense<0.000000e+00> : vector<16x128xf32>
    %15 = tpu.matmul %7, %1, %cst_13 {dimension_numbers = #tpu.dot_dimension_numbers<[1], [0], [0], [1], [0, 0, 1, 1], [], []>} : vector<16x128xf32>, vector<128x128xf32>, vector<16x128xf32> -> vector<16x128xf32>
    %cst_14 = arith.constant dense<0.000000e+00> : vector<16x128xf32>
    %16 = tpu.matmul %0, %15, %cst_14 {dimension_numbers = #tpu.dot_dimension_numbers<[1], [0], [0], [1], [0, 0, 1, 1], [], []>} : vector<16x16xf32>, vector<16x128xf32>, vector<16x128xf32> -> vector<16x128xf32>
    %17 = arith.mulf %5, %5 : vector<16x128xf32>
    %cst_15 = arith.constant dense<0.000000e+00> : vector<16x128xf32>
    %18 = tpu.matmul %17, %1, %cst_15 {dimension_numbers = #tpu.dot_dimension_numbers<[1], [0], [0], [1], [0, 0, 1, 1], [], []>} : vector<16x128xf32>, vector<128x128xf32>, vector<16x128xf32> -> vector<16x128xf32>
    %cst_16 = arith.constant dense<0.000000e+00> : vector<16x128xf32>
    %19 = tpu.matmul %0, %18, %cst_16 {dimension_numbers = #tpu.dot_dimension_numbers<[1], [0], [0], [1], [0, 0, 1, 1], [], []>} : vector<16x16xf32>, vector<16x128xf32>, vector<16x128xf32> -> vector<16x128xf32>
    %20 = arith.mulf %7, %7 : vector<16x128xf32>
    %cst_17 = arith.constant dense<0.000000e+00> : vector<16x128xf32>
    %21 = tpu.matmul %20, %1, %cst_17 {dimension_numbers = #tpu.dot_dimension_numbers<[1], [0], [0], [1], [0, 0, 1, 1], [], []>} : vector<16x128xf32>, vector<128x128xf32>, vector<16x128xf32> -> vector<16x128xf32>
    %cst_18 = arith.constant dense<0.000000e+00> : vector<16x128xf32>
    %22 = tpu.matmul %0, %21, %cst_18 {dimension_numbers = #tpu.dot_dimension_numbers<[1], [0], [0], [1], [0, 0, 1, 1], [], []>} : vector<16x16xf32>, vector<16x128xf32>, vector<16x128xf32> -> vector<16x128xf32>
    %23 = arith.mulf %5, %7 : vector<16x128xf32>
    %cst_19 = arith.constant dense<0.000000e+00> : vector<16x128xf32>
    %24 = tpu.matmul %23, %1, %cst_19 {dimension_numbers = #tpu.dot_dimension_numbers<[1], [0], [0], [1], [0, 0, 1, 1], [], []>} : vector<16x128xf32>, vector<128x128xf32>, vector<16x128xf32> -> vector<16x128xf32>
    %cst_20 = arith.constant dense<0.000000e+00> : vector<16x128xf32>
    %25 = tpu.matmul %0, %24, %cst_20 {dimension_numbers = #tpu.dot_dimension_numbers<[1], [0], [0], [1], [0, 0, 1, 1], [], []>} : vector<16x16xf32>, vector<16x128xf32>, vector<16x128xf32> -> vector<16x128xf32>
    %26 = arith.mulf %14, %14 : vector<16x128xf32>
    %27 = arith.mulf %16, %16 : vector<16x128xf32>
    %28 = arith.mulf %14, %16 : vector<16x128xf32>
    %29 = arith.subf %19, %26 : vector<16x128xf32>
    %30 = arith.subf %22, %27 : vector<16x128xf32>
    %31 = arith.subf %25, %28 : vector<16x128xf32>
    %cst_21 = arith.constant 2.000000e+00 : f32
    %32 = vector.broadcast %cst_21 : f32 to vector<16x128xf32>
    %33 = arith.mulf %32, %28 : vector<16x128xf32>
    %cst_22 = arith.constant 9.99999974E-5 : f32
    %34 = vector.broadcast %cst_22 : f32 to vector<16x128xf32>
    %35 = arith.addf %33, %34 : vector<16x128xf32>
    %cst_23 = arith.constant 2.000000e+00 : f32
    %36 = vector.broadcast %cst_23 : f32 to vector<16x128xf32>
    %37 = arith.mulf %36, %31 : vector<16x128xf32>
    %cst_24 = arith.constant 8.99999984E-4 : f32
    %38 = vector.broadcast %cst_24 : f32 to vector<16x128xf32>
    %39 = arith.addf %37, %38 : vector<16x128xf32>
    %40 = arith.mulf %35, %39 : vector<16x128xf32>
    %41 = arith.addf %26, %27 : vector<16x128xf32>
    %cst_25 = arith.constant 9.99999974E-5 : f32
    %42 = vector.broadcast %cst_25 : f32 to vector<16x128xf32>
    %43 = arith.addf %41, %42 : vector<16x128xf32>
    %44 = arith.addf %29, %30 : vector<16x128xf32>
    %cst_26 = arith.constant 8.99999984E-4 : f32
    %45 = vector.broadcast %cst_26 : f32 to vector<16x128xf32>
    %46 = arith.addf %44, %45 : vector<16x128xf32>
    %47 = arith.mulf %43, %46 : vector<16x128xf32>
    %48 = tpu.reciprocal %47 {approx = true} : vector<16x128xf32> -> vector<16x128xf32>
    %49 = arith.mulf %47, %48 : vector<16x128xf32>
    %cst_27 = arith.constant 2.000000e+00 : f32
    %50 = vector.broadcast %cst_27 : f32 to vector<16x128xf32>
    %51 = arith.subf %50, %49 : vector<16x128xf32>
    %52 = arith.mulf %48, %51 : vector<16x128xf32>
    %53 = arith.mulf %40, %52 : vector<16x128xf32>
    %cst_28 = arith.constant dense<0.000000e+00> : vector<128xf32>
    %54 = vector.multi_reduction <add>, %53, %cst_28 [0] : vector<16x128xf32> to vector<128xf32>
    %55 = vector.shape_cast %54 : vector<128xf32> to vector<1x128xf32>
    %56 = arith.addf %3, %55 : vector<1x128xf32>
    %c1 = arith.constant 1 : index
    %c0_29 = arith.constant 0 : index
    %c0_30 = arith.constant 0 : index
    %57 = vector.load %arg1[%c1, %c0_29, %c0_30] : memref<4x16x128xf32, #tpu.memory_space<vmem>>, vector<1x16x128xf32>
    %58 = vector.shape_cast %57 : vector<1x16x128xf32> to vector<16x128xf32>
    %c1_31 = arith.constant 1 : index
    %c0_32 = arith.constant 0 : index
    %c0_33 = arith.constant 0 : index
    %59 = vector.load %arg2[%c1_31, %c0_32, %c0_33] : memref<4x16x128xf32, #tpu.memory_space<vmem>>, vector<1x16x128xf32>
    %60 = vector.shape_cast %59 : vector<1x16x128xf32> to vector<16x128xf32>
    %61 = arith.subf %58, %60 : vector<16x128xf32>
    %62 = math.absf %61 : vector<16x128xf32>
    %cst_34 = arith.constant dense<0.000000e+00> : vector<128xf32>
    %63 = vector.multi_reduction <add>, %62, %cst_34 [0] : vector<16x128xf32> to vector<128xf32>
    %64 = vector.shape_cast %63 : vector<128xf32> to vector<1x128xf32>
    %65 = arith.addf %12, %64 : vector<1x128xf32>
    %cst_35 = arith.constant dense<0.000000e+00> : vector<16x128xf32>
    %66 = tpu.matmul %58, %1, %cst_35 {dimension_numbers = #tpu.dot_dimension_numbers<[1], [0], [0], [1], [0, 0, 1, 1], [], []>} : vector<16x128xf32>, vector<128x128xf32>, vector<16x128xf32> -> vector<16x128xf32>
    %cst_36 = arith.constant dense<0.000000e+00> : vector<16x128xf32>
    %67 = tpu.matmul %0, %66, %cst_36 {dimension_numbers = #tpu.dot_dimension_numbers<[1], [0], [0], [1], [0, 0, 1, 1], [], []>} : vector<16x16xf32>, vector<16x128xf32>, vector<16x128xf32> -> vector<16x128xf32>
    %cst_37 = arith.constant dense<0.000000e+00> : vector<16x128xf32>
    %68 = tpu.matmul %60, %1, %cst_37 {dimension_numbers = #tpu.dot_dimension_numbers<[1], [0], [0], [1], [0, 0, 1, 1], [], []>} : vector<16x128xf32>, vector<128x128xf32>, vector<16x128xf32> -> vector<16x128xf32>
    %cst_38 = arith.constant dense<0.000000e+00> : vector<16x128xf32>
    %69 = tpu.matmul %0, %68, %cst_38 {dimension_numbers = #tpu.dot_dimension_numbers<[1], [0], [0], [1], [0, 0, 1, 1], [], []>} : vector<16x16xf32>, vector<16x128xf32>, vector<16x128xf32> -> vector<16x128xf32>
    %70 = arith.mulf %58, %58 : vector<16x128xf32>
    %cst_39 = arith.constant dense<0.000000e+00> : vector<16x128xf32>
    %71 = tpu.matmul %70, %1, %cst_39 {dimension_numbers = #tpu.dot_dimension_numbers<[1], [0], [0], [1], [0, 0, 1, 1], [], []>} : vector<16x128xf32>, vector<128x128xf32>, vector<16x128xf32> -> vector<16x128xf32>
    %cst_40 = arith.constant dense<0.000000e+00> : vector<16x128xf32>
    %72 = tpu.matmul %0, %71, %cst_40 {dimension_numbers = #tpu.dot_dimension_numbers<[1], [0], [0], [1], [0, 0, 1, 1], [], []>} : vector<16x16xf32>, vector<16x128xf32>, vector<16x128xf32> -> vector<16x128xf32>
    %73 = arith.mulf %60, %60 : vector<16x128xf32>
    %cst_41 = arith.constant dense<0.000000e+00> : vector<16x128xf32>
    %74 = tpu.matmul %73, %1, %cst_41 {dimension_numbers = #tpu.dot_dimension_numbers<[1], [0], [0], [1], [0, 0, 1, 1], [], []>} : vector<16x128xf32>, vector<128x128xf32>, vector<16x128xf32> -> vector<16x128xf32>
    %cst_42 = arith.constant dense<0.000000e+00> : vector<16x128xf32>
    %75 = tpu.matmul %0, %74, %cst_42 {dimension_numbers = #tpu.dot_dimension_numbers<[1], [0], [0], [1], [0, 0, 1, 1], [], []>} : vector<16x16xf32>, vector<16x128xf32>, vector<16x128xf32> -> vector<16x128xf32>
    %76 = arith.mulf %58, %60 : vector<16x128xf32>
    %cst_43 = arith.constant dense<0.000000e+00> : vector<16x128xf32>
    %77 = tpu.matmul %76, %1, %cst_43 {dimension_numbers = #tpu.dot_dimension_numbers<[1], [0], [0], [1], [0, 0, 1, 1], [], []>} : vector<16x128xf32>, vector<128x128xf32>, vector<16x128xf32> -> vector<16x128xf32>
    %cst_44 = arith.constant dense<0.000000e+00> : vector<16x128xf32>
    %78 = tpu.matmul %0, %77, %cst_44 {dimension_numbers = #tpu.dot_dimension_numbers<[1], [0], [0], [1], [0, 0, 1, 1], [], []>} : vector<16x16xf32>, vector<16x128xf32>, vector<16x128xf32> -> vector<16x128xf32>
    %79 = arith.mulf %67, %67 : vector<16x128xf32>
    %80 = arith.mulf %69, %69 : vector<16x128xf32>
    %81 = arith.mulf %67, %69 : vector<16x128xf32>
    %82 = arith.subf %72, %79 : vector<16x128xf32>
    %83 = arith.subf %75, %80 : vector<16x128xf32>
    %84 = arith.subf %78, %81 : vector<16x128xf32>
    %cst_45 = arith.constant 2.000000e+00 : f32
    %85 = vector.broadcast %cst_45 : f32 to vector<16x128xf32>
    %86 = arith.mulf %85, %81 : vector<16x128xf32>
    %cst_46 = arith.constant 9.99999974E-5 : f32
    %87 = vector.broadcast %cst_46 : f32 to vector<16x128xf32>
    %88 = arith.addf %86, %87 : vector<16x128xf32>
    %cst_47 = arith.constant 2.000000e+00 : f32
    %89 = vector.broadcast %cst_47 : f32 to vector<16x128xf32>
    %90 = arith.mulf %89, %84 : vector<16x128xf32>
    %cst_48 = arith.constant 8.99999984E-4 : f32
    %91 = vector.broadcast %cst_48 : f32 to vector<16x128xf32>
    %92 = arith.addf %90, %91 : vector<16x128xf32>
    %93 = arith.mulf %88, %92 : vector<16x128xf32>
    %94 = arith.addf %79, %80 : vector<16x128xf32>
    %cst_49 = arith.constant 9.99999974E-5 : f32
    %95 = vector.broadcast %cst_49 : f32 to vector<16x128xf32>
    %96 = arith.addf %94, %95 : vector<16x128xf32>
    %97 = arith.addf %82, %83 : vector<16x128xf32>
    %cst_50 = arith.constant 8.99999984E-4 : f32
    %98 = vector.broadcast %cst_50 : f32 to vector<16x128xf32>
    %99 = arith.addf %97, %98 : vector<16x128xf32>
    %100 = arith.mulf %96, %99 : vector<16x128xf32>
    %101 = tpu.reciprocal %100 {approx = true} : vector<16x128xf32> -> vector<16x128xf32>
    %102 = arith.mulf %100, %101 : vector<16x128xf32>
    %cst_51 = arith.constant 2.000000e+00 : f32
    %103 = vector.broadcast %cst_51 : f32 to vector<16x128xf32>
    %104 = arith.subf %103, %102 : vector<16x128xf32>
    %105 = arith.mulf %101, %104 : vector<16x128xf32>
    %106 = arith.mulf %93, %105 : vector<16x128xf32>
    %cst_52 = arith.constant dense<0.000000e+00> : vector<128xf32>
    %107 = vector.multi_reduction <add>, %106, %cst_52 [0] : vector<16x128xf32> to vector<128xf32>
    %108 = vector.shape_cast %107 : vector<128xf32> to vector<1x128xf32>
    %109 = arith.addf %56, %108 : vector<1x128xf32>
    %c2 = arith.constant 2 : index
    %c0_53 = arith.constant 0 : index
    %c0_54 = arith.constant 0 : index
    %110 = vector.load %arg1[%c2, %c0_53, %c0_54] : memref<4x16x128xf32, #tpu.memory_space<vmem>>, vector<1x16x128xf32>
    %111 = vector.shape_cast %110 : vector<1x16x128xf32> to vector<16x128xf32>
    %c2_55 = arith.constant 2 : index
    %c0_56 = arith.constant 0 : index
    %c0_57 = arith.constant 0 : index
    %112 = vector.load %arg2[%c2_55, %c0_56, %c0_57] : memref<4x16x128xf32, #tpu.memory_space<vmem>>, vector<1x16x128xf32>
    %113 = vector.shape_cast %112 : vector<1x16x128xf32> to vector<16x128xf32>
    %114 = arith.subf %111, %113 : vector<16x128xf32>
    %115 = math.absf %114 : vector<16x128xf32>
    %cst_58 = arith.constant dense<0.000000e+00> : vector<128xf32>
    %116 = vector.multi_reduction <add>, %115, %cst_58 [0] : vector<16x128xf32> to vector<128xf32>
    %117 = vector.shape_cast %116 : vector<128xf32> to vector<1x128xf32>
    %118 = arith.addf %65, %117 : vector<1x128xf32>
    %cst_59 = arith.constant dense<0.000000e+00> : vector<16x128xf32>
    %119 = tpu.matmul %111, %1, %cst_59 {dimension_numbers = #tpu.dot_dimension_numbers<[1], [0], [0], [1], [0, 0, 1, 1], [], []>} : vector<16x128xf32>, vector<128x128xf32>, vector<16x128xf32> -> vector<16x128xf32>
    %cst_60 = arith.constant dense<0.000000e+00> : vector<16x128xf32>
    %120 = tpu.matmul %0, %119, %cst_60 {dimension_numbers = #tpu.dot_dimension_numbers<[1], [0], [0], [1], [0, 0, 1, 1], [], []>} : vector<16x16xf32>, vector<16x128xf32>, vector<16x128xf32> -> vector<16x128xf32>
    %cst_61 = arith.constant dense<0.000000e+00> : vector<16x128xf32>
    %121 = tpu.matmul %113, %1, %cst_61 {dimension_numbers = #tpu.dot_dimension_numbers<[1], [0], [0], [1], [0, 0, 1, 1], [], []>} : vector<16x128xf32>, vector<128x128xf32>, vector<16x128xf32> -> vector<16x128xf32>
    %cst_62 = arith.constant dense<0.000000e+00> : vector<16x128xf32>
    %122 = tpu.matmul %0, %121, %cst_62 {dimension_numbers = #tpu.dot_dimension_numbers<[1], [0], [0], [1], [0, 0, 1, 1], [], []>} : vector<16x16xf32>, vector<16x128xf32>, vector<16x128xf32> -> vector<16x128xf32>
    %123 = arith.mulf %111, %111 : vector<16x128xf32>
    %cst_63 = arith.constant dense<0.000000e+00> : vector<16x128xf32>
    %124 = tpu.matmul %123, %1, %cst_63 {dimension_numbers = #tpu.dot_dimension_numbers<[1], [0], [0], [1], [0, 0, 1, 1], [], []>} : vector<16x128xf32>, vector<128x128xf32>, vector<16x128xf32> -> vector<16x128xf32>
    %cst_64 = arith.constant dense<0.000000e+00> : vector<16x128xf32>
    %125 = tpu.matmul %0, %124, %cst_64 {dimension_numbers = #tpu.dot_dimension_numbers<[1], [0], [0], [1], [0, 0, 1, 1], [], []>} : vector<16x16xf32>, vector<16x128xf32>, vector<16x128xf32> -> vector<16x128xf32>
    %126 = arith.mulf %113, %113 : vector<16x128xf32>
    %cst_65 = arith.constant dense<0.000000e+00> : vector<16x128xf32>
    %127 = tpu.matmul %126, %1, %cst_65 {dimension_numbers = #tpu.dot_dimension_numbers<[1], [0], [0], [1], [0, 0, 1, 1], [], []>} : vector<16x128xf32>, vector<128x128xf32>, vector<16x128xf32> -> vector<16x128xf32>
    %cst_66 = arith.constant dense<0.000000e+00> : vector<16x128xf32>
    %128 = tpu.matmul %0, %127, %cst_66 {dimension_numbers = #tpu.dot_dimension_numbers<[1], [0], [0], [1], [0, 0, 1, 1], [], []>} : vector<16x16xf32>, vector<16x128xf32>, vector<16x128xf32> -> vector<16x128xf32>
    %129 = arith.mulf %111, %113 : vector<16x128xf32>
    %cst_67 = arith.constant dense<0.000000e+00> : vector<16x128xf32>
    %130 = tpu.matmul %129, %1, %cst_67 {dimension_numbers = #tpu.dot_dimension_numbers<[1], [0], [0], [1], [0, 0, 1, 1], [], []>} : vector<16x128xf32>, vector<128x128xf32>, vector<16x128xf32> -> vector<16x128xf32>
    %cst_68 = arith.constant dense<0.000000e+00> : vector<16x128xf32>
    %131 = tpu.matmul %0, %130, %cst_68 {dimension_numbers = #tpu.dot_dimension_numbers<[1], [0], [0], [1], [0, 0, 1, 1], [], []>} : vector<16x16xf32>, vector<16x128xf32>, vector<16x128xf32> -> vector<16x128xf32>
    %132 = arith.mulf %120, %120 : vector<16x128xf32>
    %133 = arith.mulf %122, %122 : vector<16x128xf32>
    %134 = arith.mulf %120, %122 : vector<16x128xf32>
    %135 = arith.subf %125, %132 : vector<16x128xf32>
    %136 = arith.subf %128, %133 : vector<16x128xf32>
    %137 = arith.subf %131, %134 : vector<16x128xf32>
    %cst_69 = arith.constant 2.000000e+00 : f32
    %138 = vector.broadcast %cst_69 : f32 to vector<16x128xf32>
    %139 = arith.mulf %138, %134 : vector<16x128xf32>
    %cst_70 = arith.constant 9.99999974E-5 : f32
    %140 = vector.broadcast %cst_70 : f32 to vector<16x128xf32>
    %141 = arith.addf %139, %140 : vector<16x128xf32>
    %cst_71 = arith.constant 2.000000e+00 : f32
    %142 = vector.broadcast %cst_71 : f32 to vector<16x128xf32>
    %143 = arith.mulf %142, %137 : vector<16x128xf32>
    %cst_72 = arith.constant 8.99999984E-4 : f32
    %144 = vector.broadcast %cst_72 : f32 to vector<16x128xf32>
    %145 = arith.addf %143, %144 : vector<16x128xf32>
    %146 = arith.mulf %141, %145 : vector<16x128xf32>
    %147 = arith.addf %132, %133 : vector<16x128xf32>
    %cst_73 = arith.constant 9.99999974E-5 : f32
    %148 = vector.broadcast %cst_73 : f32 to vector<16x128xf32>
    %149 = arith.addf %147, %148 : vector<16x128xf32>
    %150 = arith.addf %135, %136 : vector<16x128xf32>
    %cst_74 = arith.constant 8.99999984E-4 : f32
    %151 = vector.broadcast %cst_74 : f32 to vector<16x128xf32>
    %152 = arith.addf %150, %151 : vector<16x128xf32>
    %153 = arith.mulf %149, %152 : vector<16x128xf32>
    %154 = tpu.reciprocal %153 {approx = true} : vector<16x128xf32> -> vector<16x128xf32>
    %155 = arith.mulf %153, %154 : vector<16x128xf32>
    %cst_75 = arith.constant 2.000000e+00 : f32
    %156 = vector.broadcast %cst_75 : f32 to vector<16x128xf32>
    %157 = arith.subf %156, %155 : vector<16x128xf32>
    %158 = arith.mulf %154, %157 : vector<16x128xf32>
    %159 = arith.mulf %146, %158 : vector<16x128xf32>
    %cst_76 = arith.constant dense<0.000000e+00> : vector<128xf32>
    %160 = vector.multi_reduction <add>, %159, %cst_76 [0] : vector<16x128xf32> to vector<128xf32>
    %161 = vector.shape_cast %160 : vector<128xf32> to vector<1x128xf32>
    %162 = arith.addf %109, %161 : vector<1x128xf32>
    %c3 = arith.constant 3 : index
    %c0_77 = arith.constant 0 : index
    %c0_78 = arith.constant 0 : index
    %163 = vector.load %arg1[%c3, %c0_77, %c0_78] : memref<4x16x128xf32, #tpu.memory_space<vmem>>, vector<1x16x128xf32>
    %164 = vector.shape_cast %163 : vector<1x16x128xf32> to vector<16x128xf32>
    %c3_79 = arith.constant 3 : index
    %c0_80 = arith.constant 0 : index
    %c0_81 = arith.constant 0 : index
    %165 = vector.load %arg2[%c3_79, %c0_80, %c0_81] : memref<4x16x128xf32, #tpu.memory_space<vmem>>, vector<1x16x128xf32>
    %166 = vector.shape_cast %165 : vector<1x16x128xf32> to vector<16x128xf32>
    %167 = arith.subf %164, %166 : vector<16x128xf32>
    %168 = math.absf %167 : vector<16x128xf32>
    %cst_82 = arith.constant dense<0.000000e+00> : vector<128xf32>
    %169 = vector.multi_reduction <add>, %168, %cst_82 [0] : vector<16x128xf32> to vector<128xf32>
    %170 = vector.shape_cast %169 : vector<128xf32> to vector<1x128xf32>
    %171 = arith.addf %118, %170 : vector<1x128xf32>
    %cst_83 = arith.constant dense<0.000000e+00> : vector<16x128xf32>
    %172 = tpu.matmul %164, %1, %cst_83 {dimension_numbers = #tpu.dot_dimension_numbers<[1], [0], [0], [1], [0, 0, 1, 1], [], []>} : vector<16x128xf32>, vector<128x128xf32>, vector<16x128xf32> -> vector<16x128xf32>
    %cst_84 = arith.constant dense<0.000000e+00> : vector<16x128xf32>
    %173 = tpu.matmul %0, %172, %cst_84 {dimension_numbers = #tpu.dot_dimension_numbers<[1], [0], [0], [1], [0, 0, 1, 1], [], []>} : vector<16x16xf32>, vector<16x128xf32>, vector<16x128xf32> -> vector<16x128xf32>
    %cst_85 = arith.constant dense<0.000000e+00> : vector<16x128xf32>
    %174 = tpu.matmul %166, %1, %cst_85 {dimension_numbers = #tpu.dot_dimension_numbers<[1], [0], [0], [1], [0, 0, 1, 1], [], []>} : vector<16x128xf32>, vector<128x128xf32>, vector<16x128xf32> -> vector<16x128xf32>
    %cst_86 = arith.constant dense<0.000000e+00> : vector<16x128xf32>
    %175 = tpu.matmul %0, %174, %cst_86 {dimension_numbers = #tpu.dot_dimension_numbers<[1], [0], [0], [1], [0, 0, 1, 1], [], []>} : vector<16x16xf32>, vector<16x128xf32>, vector<16x128xf32> -> vector<16x128xf32>
    %176 = arith.mulf %164, %164 : vector<16x128xf32>
    %cst_87 = arith.constant dense<0.000000e+00> : vector<16x128xf32>
    %177 = tpu.matmul %176, %1, %cst_87 {dimension_numbers = #tpu.dot_dimension_numbers<[1], [0], [0], [1], [0, 0, 1, 1], [], []>} : vector<16x128xf32>, vector<128x128xf32>, vector<16x128xf32> -> vector<16x128xf32>
    %cst_88 = arith.constant dense<0.000000e+00> : vector<16x128xf32>
    %178 = tpu.matmul %0, %177, %cst_88 {dimension_numbers = #tpu.dot_dimension_numbers<[1], [0], [0], [1], [0, 0, 1, 1], [], []>} : vector<16x16xf32>, vector<16x128xf32>, vector<16x128xf32> -> vector<16x128xf32>
    %179 = arith.mulf %166, %166 : vector<16x128xf32>
    %cst_89 = arith.constant dense<0.000000e+00> : vector<16x128xf32>
    %180 = tpu.matmul %179, %1, %cst_89 {dimension_numbers = #tpu.dot_dimension_numbers<[1], [0], [0], [1], [0, 0, 1, 1], [], []>} : vector<16x128xf32>, vector<128x128xf32>, vector<16x128xf32> -> vector<16x128xf32>
    %cst_90 = arith.constant dense<0.000000e+00> : vector<16x128xf32>
    %181 = tpu.matmul %0, %180, %cst_90 {dimension_numbers = #tpu.dot_dimension_numbers<[1], [0], [0], [1], [0, 0, 1, 1], [], []>} : vector<16x16xf32>, vector<16x128xf32>, vector<16x128xf32> -> vector<16x128xf32>
    %182 = arith.mulf %164, %166 : vector<16x128xf32>
    %cst_91 = arith.constant dense<0.000000e+00> : vector<16x128xf32>
    %183 = tpu.matmul %182, %1, %cst_91 {dimension_numbers = #tpu.dot_dimension_numbers<[1], [0], [0], [1], [0, 0, 1, 1], [], []>} : vector<16x128xf32>, vector<128x128xf32>, vector<16x128xf32> -> vector<16x128xf32>
    %cst_92 = arith.constant dense<0.000000e+00> : vector<16x128xf32>
    %184 = tpu.matmul %0, %183, %cst_92 {dimension_numbers = #tpu.dot_dimension_numbers<[1], [0], [0], [1], [0, 0, 1, 1], [], []>} : vector<16x16xf32>, vector<16x128xf32>, vector<16x128xf32> -> vector<16x128xf32>
    %185 = arith.mulf %173, %173 : vector<16x128xf32>
    %186 = arith.mulf %175, %175 : vector<16x128xf32>
    %187 = arith.mulf %173, %175 : vector<16x128xf32>
    %188 = arith.subf %178, %185 : vector<16x128xf32>
    %189 = arith.subf %181, %186 : vector<16x128xf32>
    %190 = arith.subf %184, %187 : vector<16x128xf32>
    %cst_93 = arith.constant 2.000000e+00 : f32
    %191 = vector.broadcast %cst_93 : f32 to vector<16x128xf32>
    %192 = arith.mulf %191, %187 : vector<16x128xf32>
    %cst_94 = arith.constant 9.99999974E-5 : f32
    %193 = vector.broadcast %cst_94 : f32 to vector<16x128xf32>
    %194 = arith.addf %192, %193 : vector<16x128xf32>
    %cst_95 = arith.constant 2.000000e+00 : f32
    %195 = vector.broadcast %cst_95 : f32 to vector<16x128xf32>
    %196 = arith.mulf %195, %190 : vector<16x128xf32>
    %cst_96 = arith.constant 8.99999984E-4 : f32
    %197 = vector.broadcast %cst_96 : f32 to vector<16x128xf32>
    %198 = arith.addf %196, %197 : vector<16x128xf32>
    %199 = arith.mulf %194, %198 : vector<16x128xf32>
    %200 = arith.addf %185, %186 : vector<16x128xf32>
    %cst_97 = arith.constant 9.99999974E-5 : f32
    %201 = vector.broadcast %cst_97 : f32 to vector<16x128xf32>
    %202 = arith.addf %200, %201 : vector<16x128xf32>
    %203 = arith.addf %188, %189 : vector<16x128xf32>
    %cst_98 = arith.constant 8.99999984E-4 : f32
    %204 = vector.broadcast %cst_98 : f32 to vector<16x128xf32>
    %205 = arith.addf %203, %204 : vector<16x128xf32>
    %206 = arith.mulf %202, %205 : vector<16x128xf32>
    %207 = tpu.reciprocal %206 {approx = true} : vector<16x128xf32> -> vector<16x128xf32>
    %208 = arith.mulf %206, %207 : vector<16x128xf32>
    %cst_99 = arith.constant 2.000000e+00 : f32
    %209 = vector.broadcast %cst_99 : f32 to vector<16x128xf32>
    %210 = arith.subf %209, %208 : vector<16x128xf32>
    %211 = arith.mulf %207, %210 : vector<16x128xf32>
    %212 = arith.mulf %199, %211 : vector<16x128xf32>
    %cst_100 = arith.constant dense<0.000000e+00> : vector<128xf32>
    %213 = vector.multi_reduction <add>, %212, %cst_100 [0] : vector<16x128xf32> to vector<128xf32>
    %214 = vector.shape_cast %213 : vector<128xf32> to vector<1x128xf32>
    %215 = arith.addf %162, %214 : vector<1x128xf32>
    %216 = vector.shape_cast %171 : vector<1x128xf32> to vector<1x1x128xf32>
    %c0_101 = arith.constant 0 : index
    %c0_102 = arith.constant 0 : index
    %c0_103 = arith.constant 0 : index
    %217 = vector.load %arg5[%c0_101, %c0_102, %c0_103] : memref<1x1x128xf32, #tpu.memory_space<vmem>>, vector<1x1x128xf32>
    tpu.vector_store %arg5[%c0_101, %c0_102, %c0_103], %216 {strides = array<i32>} : memref<1x1x128xf32, #tpu.memory_space<vmem>>, vector<1x1x128xf32>,
    %218 = vector.shape_cast %215 : vector<1x128xf32> to vector<1x1x128xf32>
    %c0_104 = arith.constant 0 : index
    %c0_105 = arith.constant 0 : index
    %c0_106 = arith.constant 0 : index
    %219 = vector.load %arg6[%c0_104, %c0_105, %c0_106] : memref<1x1x128xf32, #tpu.memory_space<vmem>>, vector<1x1x128xf32>
    tpu.vector_store %arg6[%c0_104, %c0_105, %c0_106], %218 {strides = array<i32>} : memref<1x1x128xf32, #tpu.memory_space<vmem>>, vector<1x1x128xf32>,
    return
  }
  func.func @transform_0(%arg0: i32) -> (i32, i32, i32) {
    %c0_i32 = arith.constant 0 : i32
    %c0_i32_0 = arith.constant 0 : i32
    %c0_i32_1 = arith.constant 0 : i32
    return %arg0, %c0_i32, %c0_i32_0 : i32, i32, i32
  }
  func.func @transform_1(%arg0: i32) -> (i32, i32, i32) {
    %c0_i32 = arith.constant 0 : i32
    %c0_i32_0 = arith.constant 0 : i32
    %c0_i32_1 = arith.constant 0 : i32
    return %arg0, %c0_i32, %c0_i32_0 : i32, i32, i32
  }
  func.func @transform_2(%arg0: i32) -> (i32, i32) {
    %c0_i32 = arith.constant 0 : i32
    %c0_i32_0 = arith.constant 0 : i32
    %c0_i32_1 = arith.constant 0 : i32
    return %c0_i32, %c0_i32_0 : i32, i32
  }
  func.func @transform_3(%arg0: i32) -> (i32, i32) {
    %c0_i32 = arith.constant 0 : i32
    %c0_i32_0 = arith.constant 0 : i32
    %c0_i32_1 = arith.constant 0 : i32
    return %c0_i32, %c0_i32_0 : i32, i32
  }
  func.func @transform_4(%arg0: i32) -> (i32, i32, i32) {
    %c0_i32 = arith.constant 0 : i32
    %c0_i32_0 = arith.constant 0 : i32
    %c0_i32_1 = arith.constant 0 : i32
    return %arg0, %c0_i32, %c0_i32_0 : i32, i32, i32
  }
  func.func @transform_5(%arg0: i32) -> (i32, i32, i32) {
    %c0_i32 = arith.constant 0 : i32
    %c0_i32_0 = arith.constant 0 : i32
    %c0_i32_1 = arith.constant 0 : i32
    return %arg0, %c0_i32, %c0_i32_0 : i32, i32, i32
  }
}

</mosaic_0001>

<bundles_post_ra>
// kernel: tpu_custom_call.1
= control target key start
LH: loop header
LB: loop body
LE: loop exit
PB: predicated region body
PF: predicated region fallthrough
CT: control target
= control target key end

     0   :  { %s6833_s0 = inlined_call_operand.hbm [shape: f32[8,16,128], index: 0, kind: input, shape index: {}]   ;;  %s6834_s1 = inlined_call_operand.hbm [shape: f32[8,16,128], index: 1, kind: input, shape index: {}]   ;;  %s6835_s2 = inlined_call_operand.hbm [shape: f32[16,16], index: 2, kind: input, shape index: {}]   ;;  %s6836_s3 = inlined_call_operand.hbm [shape: f32[128,128], index: 3, kind: input, shape index: {}]   ;;  %s6837_s4 = inlined_call_operand.hbm [shape: f32[2,1,128], index: 4, kind: output, shape index: {0}]   ;;  %s6838_s5 = inlined_call_operand.hbm [shape: f32[2,1,128], index: 5, kind: output, shape index: {1}]  }
   0x1   :  { %6846 = sst [smem:[#allocation19_spill]] %s6833_s0 }
   0x2   :  { %6847 = sst [smem:[#allocation20_spill]] %s6835_s2 }
   0x3   :  { %11 = vsyncpa [#allocation3], 0 }
   0x4   :  { %13 = vsyncpa [#allocation3 + $0x1], 0 }
   0x5   :  { %14 = vsyncpa [#allocation6], 0 }
   0x6   :  { %16 = vsyncpa [#allocation6 + $0x1], 0 }
   0x7   :  { %17 = vsyncpa [#allocation9], 0 }
   0x8   :  { %18 = vsyncpa [#allocation4], 0 }
   0x9   :  { %20 = vsyncpa [#allocation4 + $0x1], 0 }
   0xa   :  { %21 = vsyncpa [#allocation12], 0 }
   0xb   :  { %23 = vsyncpa [#allocation12 + $0x1], 0  ;;  %s5547_s18 = smov 0   ;;  %s5549_s19 = smov 0  }
   0xc   :  { %s5551_s20 = smov 0   ;;  %s5553_s21 = smov 0  }
   0xd LB: > { %s5568_s22 = sadd.s32 4294967295, %s5507_s21   ;;  %s3812_s23 = sadd.s32 4294967294, %s5507_s21   ;;  %s5507_s21 = sphi %s5553_s21, %s6869_s21   ;;  %s5503_s20 = sphi %s5551_s20, %s6868_s20   ;;  %s5499_s19 = sphi %s5549_s19, %s6867_s19   ;;  %s5495_s18 = sphi %s5547_s18, %s6866_s18  }
   0xe   : > { %p49_p0 = scmp.ne.s32.totalorder %s5499_s19, %s5495_s18  ;;  %p6843_p1 = scmp.eq.s32.totalorder %s5568_s22, 0 }
   0xf   : > { %p141_p2 = scmp.eq.s32.totalorder %s5568_s22, 1  ;;  %p147_p3 = scmp.eq.s32.totalorder %s3812_s23, 1 }
  0x10   : > { %p5577_p4 = por %p6843_p1, %p49_p0  ;;  %p3813_p5 = scmp.ge.s32.totalorder %s5507_s21, 1 }
  0x11   : > { %p5582_p6 = por %p147_p3, %p49_p0  ;;  %p180_p7 = scmp.lt.s32.totalorder %s5507_s21, 3 }
  0x12   : > { %s6848_s24 = scalar_select %p5577_p4, 1, 0 }
  0x13   : > { %s6849_s25 = scalar_select %p5582_p6, 1, 0 }
  0x14   : > { %p5587_p8 = pnand %p3813_p5, %p180_p7  ;;  %s5509_s27 = smov [#allocation7]  }
  0x15   : > { %s192_s28 = sshll.u32 %s5509_s27, 4  ;;  %s5510_s30 = smov [#allocation8]   ;;  %s193_s28 = int_to_ptr.vmem [resolvable:$true] %s192_s28 }
  0x16   : > { %p5186_p9 = pneg %p5587_p8  ;;  %s205_s6 = sshll.u32 %s5510_s30, 4  ;;  %s206_s6 = int_to_ptr.vmem [resolvable:$true] %s205_s6 }
  0x17   : > { %s5304_s7 = scalar_lea.vmem %s193_s28, 256  ;;  %p5312_p5 = scmp.lt.s32.totalorder %s193_s28, %s193_s28 }
  0x18   : > { %p5596_p11 = pnand %p5186_p9, %p6843_p1  ;;  %p5305_p13 = scmp.ne.s32.totalorder %s193_s28, %s5304_s7 }
  0x19   : > { %p5313_p7 = scmp.lt.s32.totalorder %s5304_s7, %s5304_s7 }
  0x1a   : > { %p5295_p12 = pneg %p5596_p11 }
  0x1b   : > { %p5314_p10 = por %p5313_p7, %p5312_p5 }
  0x1c   : > { %p5307_p0 = pnand %p5305_p13, %p5295_p12 }
  0x1e   : > { %p5308_p3 = pneg %p5307_p0 }
  0x20   : > { %p5315_p9 = pnand %p5314_p10, %p5308_p3 }
  0x22   : > { %5318 = shalt.err (!%p5315_p9)
}
  0x23   : > { %s6839_s8 = smov 128   ;;  %s6841_s9 = smov 8  }
  0x24   : > { %s6852_s2 = sld [smem:[#allocation20_spill]]  ;;  %s5330_s12 = scalar_lea.vmem %s206_s6, 2048 }
  0x25   : > { %p5331_p13 = scmp.ne.s32.totalorder %s206_s6, %s5330_s12  ;;  %p5338_p10 = scmp.lt.s32.totalorder %s206_s6, %s206_s6 }
  0x26   : > { %p5339_p3 = scmp.lt.s32.totalorder %s5330_s12, %s5330_s12 }
  0x27   : > { %p5333_p0 = pnand %p5331_p13, %p5295_p12 }
  0x28   : > { %p5340_p7 = por %p5339_p3, %p5338_p10 }
  0x29   : > { %p5334_p5 = pneg %p5333_p0 }
  0x2a   : > { %5189 = dma.hbm_to_vmem [thread:$0]  (!%p5596_p11), %s6852_s2, 256, %s193_s28, [#allocation6], %s6839_s8, %s6839_s8, %s6841_s9  }
  0x2b   : > { %p5341_p9 = pnand %p5340_p7, %p5334_p5 }
  0x2d   : > { %5344 = shalt.err (!%p5341_p9)
}
  0x2e   : > { %5192 = dma.hbm_to_vmem [thread:$0]  (!%p5596_p11), %s6836_s3, 2048, %s206_s6, [#allocation9], %s6839_s8, %s6839_s8, %s6841_s9  }
  0x2f   : > { %s5625_s15 = sadd.s32 1, %s5507_s21   ;;  %s36_s16 = sadd.s32 1, %s5503_s20 }
  0x30   : > { %s33_s17 = ssub.s32 %s5507_s21, %s5625_s15  ;;  %p43_p12 = scmp.ne.s32.totalorder %s5503_s20, %s5499_s19 }
  0x31   : > { %p34_p13 = scmp.eq.s32.totalorder %s33_s17, 0  ;;  %p44_p0 = scmp.eq.s32.totalorder %s5507_s21, 0 }
  0x32   : > { %p5635_p5 = por %p141_p2, %p43_p12  ;;  %p5209_p10 = scmp.lt.s32.totalorder %s5507_s21, 2 }
  0x33   : > { %s5641_s27 = scalar_select %p34_p13, %s5503_s20, %s36_s16  }
  0x34   : > { %s6853_s23 = scalar_select %p5635_p5, 1, 0 }
  0x35   : > { %p45_p3 = por %p44_p0, %p43_p12  ;;  %s219_s28 = sand.u32 1, %s5503_s20  }
  0x36   : > { %s3817_s29 = sshll.u32 %s219_s28, 6  ;;  %s3887_s30 = sshll.u32 %s5507_s21, 10 }
  0x37   : > { %s6854_s0 = sld [smem:[#allocation19_spill]]  ;;  %s223_s11 = scalar_lea.vmem [#allocation2], %s3817_s29 }
  0x38   : > { %s231_s12 = sshll.u32 %s223_s11, 4  ;;  %p5652_p2 = pnand %p5209_p10, %p45_p3  ;;  %s5650_s12 = int_to_ptr.vmem [resolvable:$true] %s231_s12 }
  0x39   : > { %s5659_s17 = scalar_lea.hbm %s6834_s1, %s3887_s30  ;;  %s245_s6 = scalar_lea.vmem [#allocation5], %s3817_s29 }
  0x3a   : > { %s5661_s7 = sshll.u32 %s245_s6, 4  ;;  %s5663_s8 = scalar_lea.sflag [#allocation3], %s219_s28  ;;  %s5694_s7 = int_to_ptr.vmem [resolvable:$true] %s5661_s7 }
  0x3b   : > { %p5347_p7 = pneg %p5652_p2 }
  0x3d   : > { %s5648_s10 = scalar_lea.hbm %s6854_s0, %s3887_s30  ;;  %s5350_s14 = scalar_lea.hbm %s6854_s0, 2048 }
  0x3e   : > { %s5345_s9 = scalar_lea.hbm %s5648_s10, 1024  ;;  %p5351_p13 = scmp.lt.s32.totalorder %s5648_s10, %s6854_s0 }
  0x3f   : > { %p5346_p11 = scmp.ne.s32.totalorder %s5648_s10, %s5345_s9  ;;  %p5352_p0 = scmp.lt.s32.totalorder %s5350_s14, %s5345_s9 }
  0x41   : > { %p5348_p9 = pnand %p5347_p7, %p5346_p11  ;;  %p5353_p10 = por %p5352_p0, %p5351_p13 }
  0x43   : > { %p5349_p12 = pneg %p5348_p9 }
  0x45   : > { %p5354_p3 = pnand %p5353_p10, %p5349_p12 }
  0x47   : > { %5357 = shalt.err (!%p5354_p3)
}
  0x48   : > { %s5358_s28 = scalar_lea.vmem %s5650_s12, 1024  ;;  %s5513_s2 = smov [#allocation2]  }
  0x49   : > { %p5359_p1 = scmp.ne.s32.totalorder %s5650_s12, %s5358_s28  ;;  %s5363_s29 = sshll.u32 %s5513_s2, 4  ;;  %s5364_s29 = int_to_ptr.vmem [resolvable:$false] %s5363_s29 }
  0x4a   : > { %s5365_s6 = scalar_lea.vmem %s5364_s29, 2048  ;;  %p5366_p6 = scmp.lt.s32.totalorder %s5650_s12, %s5364_s29 }
  0x4b   : > { %p5361_p11 = pnand %p5359_p1, %p5347_p7  ;;  %p5367_p5 = scmp.lt.s32.totalorder %s5365_s6, %s5358_s28 }
  0x4d   : > { %p5362_p9 = pneg %p5361_p11  ;;  %p5368_p4 = por %p5367_p5, %p5366_p6 }
  0x4f   : > { %p5369_p13 = pnand %p5368_p4, %p5362_p9 }
  0x51   : > { %5372 = shalt.err (!%p5369_p13)
}
  0x52   : > { %s6856_s9 = smov 8   ;;  %s6857_s11 = smov 128  }
  0x53   : > { %5196 = dma.hbm_to_vmem [thread:$0]  (!%p5652_p2), %s5648_s10, 1024, %s5650_s12, %s5663_s8, %s6857_s11, %s6857_s11, %s6856_s9  }
  0x54   : > { %s241_s14 = sand.u32 1, %s5507_s21   ;;  %s5373_s30 = scalar_lea.hbm %s5659_s17, 1024 }
  0x55   : > { %s242_s16 = scalar_lea.sflag [#allocation6], %s241_s14  ;;  %p5374_p1 = scmp.ne.s32.totalorder %s5659_s17, %s5373_s30 }
  0x56   : > { %s5378_s29 = scalar_lea.hbm %s6834_s1, 2048  ;;  %p5379_p5 = scmp.lt.s32.totalorder %s5659_s17, %s6834_s1 }
  0x57   : > { %p5376_p4 = pnand %p5374_p1, %p5347_p7  ;;  %p5380_p12 = scmp.lt.s32.totalorder %s5378_s29, %s5373_s30 }
  0x59   : > { %p5377_p6 = pneg %p5376_p4  ;;  %p5381_p0 = por %p5380_p12, %p5379_p5 }
  0x5b   : > { %p5382_p10 = pnand %p5381_p0, %p5377_p6 }
  0x5d   : > { %5385 = shalt.err (!%p5382_p10)
}
  0x5e   : > { %s5386_s8 = scalar_lea.vmem %s5694_s7, 1024  ;;  %s5514_s10 = smov [#allocation5]  }
  0x5f   : > { %p5387_p3 = scmp.ne.s32.totalorder %s5694_s7, %s5386_s8  ;;  %s5391_s12 = sshll.u32 %s5514_s10, 4  ;;  %s5392_s12 = int_to_ptr.vmem [resolvable:$false] %s5391_s12 }
  0x60   : > { %s5393_s14 = scalar_lea.vmem %s5392_s12, 2048  ;;  %p5394_p13 = scmp.lt.s32.totalorder %s5694_s7, %s5392_s12 }
  0x61   : > { %p5389_p11 = pnand %p5387_p3, %p5347_p7  ;;  %p5395_p1 = scmp.lt.s32.totalorder %s5393_s14, %s5386_s8 }
  0x63   : > { %p5390_p9 = pneg %p5389_p11  ;;  %p5396_p4 = por %p5395_p1, %p5394_p13 }
  0x65   : > { %p5397_p5 = pnand %p5396_p4, %p5390_p9 }
  0x67   : > { %5400 = shalt.err (!%p5397_p5)
}
  0x68   : > { %5199 = dma.hbm_to_vmem [thread:$0]  (!%p5652_p2), %s5659_s17, 1024, %s5694_s7, %s242_s16, %s6857_s11, %s6857_s11, %s6856_s9  }
  0x69   : > { %265 = sbr.rel (%p5587_p8) target bundleno = 4936 (0x1348), region = 36  ;;  %s5725_s0 = sand.u32 (!%p5587_p8), 1, %s5499_s19  }
  0x6a   : > { %s3826_s30 = sshll.u32 (!%p5587_p8), %s5725_s0, 6  ;;  %s268_s28 = scalar_lea.sflag (!%p5587_p8), [#allocation3], %s5725_s0 }
  0x6b   : > { %s5729_s2 = scalar_lea.vmem (!%p5587_p8), [#allocation2], %s3826_s30  ;;  %p6858_p7 = scmp.ne.s32.totalorder (!%p5587_p8), %s6848_s24, 0 }
  0x6e   : > { %5470 = dma.done.wait (%p6858_p7), %s268_s28, 1024  }
  0x6f   : > { %5472 = vsyncadd (%p6858_p7), %s268_s28, 4294966272  ;;  %s276_s13 = sand.u32 1, %s5568_s22   ;;  %s5736_s17 = scalar_lea.vmem [#allocation5], %s3826_s30 }
  0x70   : > { %s277_s26 = scalar_lea.sflag [#allocation6], %s276_s13 }
  0x71   : > { %5474 = dma.done.wait (%p6858_p7), %s277_s26, 1024  }
  0x72   : > { %5476 = vsyncadd (%p6858_p7), %s277_s26, 4294966272  ;;  %p6859_p8 = scmp.eq.s32.totalorder %s5568_s22, 0 }
  0x74   : > { %5478 = dma.done.wait (%p6859_p8), [#allocation6], 256   ;;  %p6860_p2 = pmov %p6859_p8 }
  0x76   : > { %5480 = vsyncadd (%p6860_p2), [#allocation6], 4294967040  ;;  %p6861_p6 = pmov %p6860_p2 }
  0x77   : > { %p6862_p12 = pmov %p6860_p2 }
  0x78   : > { %5482 = dma.done.wait (%p6861_p6), [#allocation9], 2048  }
  0x79   : > { %5484 = vsyncadd (%p6862_p12), [#allocation9], 4294965248  ;;  %v5750_v0 = vld [vmem:[#allocation8 + $0x78] sm:$0xff]  ;;  %v5752_v1 = vld [vmem:[#allocation8 + $0x70] sm:$0xff]  ;;  %vm434_vm0 = vcmask 130048   ;;  %s3882_s24 = sshll.u32 %s5568_s22, 4 }
  0x7a   : > { %4330 = vmatprep.subr.mxu0 %v5750_v0  ;;  %v5756_v2 = vld [vmem:[#allocation8 + $0x68] sm:$0xff]  ;;  %v5760_v3 = vld [vmem:[#allocation8 + $0x60] sm:$0xff]  ;;  %v5764_v4 = vld [vmem:[%s5729_s2] sm:$0xff]  ;;  %s316_s7 = scalar_lea.vmem [#allocation10], %s5725_s0  ;;  %s3661_s29 = scalar_lea.hbm %s6837_s4, %s3882_s24 }
  0x7b   : > { %4331 = vmatpush3.msra.mxu0 %v5750_v0  ;;  %v5767_v5 = vld [vmem:[#allocation8 + $0x58] sm:$0xff]  ;;  %4362 = vmatprep.mubr.f32.mxu0 %v5764_v4  ;;  %v5772_v6 = vld [vmem:[#allocation8 + $0x50] sm:$0xff]  ;;  %v5776_v7 = vld [vmem:[#allocation8 + $0x48] sm:$0xff]  ;;  %v666_v28 = vmul.f32 %v5764_v4, %v5764_v4  ;;  %s3663_s9 = sshll.u32 %s316_s7, 4  ;;  %s3647_s6 = scalar_lea.sflag [#allocation4], %s5725_s0  ;;  %s3664_s9 = int_to_ptr.vmem [resolvable:$true] %s3663_s9 }
  0x7c   : > { %4332 = vmatprep.subr.mxu0 %v5752_v1  ;;  %v5780_v8 = vld [vmem:[#allocation8 + $0x40] sm:$0xff]  ;;  %v5784_v9 = vld [vmem:[#allocation8 + $0x38] sm:$0xff]  ;;  %v5788_v10 = vld [vmem:[#allocation8 + $0x30] sm:$0xff]  ;;  %s5401_s8 = scalar_lea.vmem %s3664_s9, 16  ;;  %p6863_p10 = scmp.ne.s32.totalorder %s6853_s23, 0 }
  0x7d   : > { %4333 = vmatpush3.msra.mxu0 %v5752_v1  ;;  %v5792_v11 = vld [vmem:[#allocation8 + $0x28] sm:$0xff]  ;;  %v5796_v12 = vld [vmem:[#allocation8 + $0x20] sm:$0xff]  ;;  %v5800_v13 = vld [vmem:[#allocation8 + $0x18] sm:$0xff]  ;;  %p5402_p0 = scmp.ne.s32.totalorder %s3664_s9, %s5401_s8  ;;  %s5515_s10 = smov [#allocation10]  }
  0x7e   : > { %4334 = vmatprep.subr.mxu0 %v5756_v2  ;;  %v5804_v14 = vld [vmem:[#allocation8 + $0x10] sm:$0xff]  ;;  %v5808_v15 = vld [vmem:[#allocation8 + $0x8] sm:$0xff]  ;;  %v5812_v16 = vld [vmem:[#allocation8] sm:$0xff]  ;;  %s5405_s12 = sshll.u32 %s5515_s10, 4  ;;  %s5406_s12 = int_to_ptr.vmem [resolvable:$false] %s5405_s12 }
  0x7f   : > { %4335 = vmatpush3.msra.mxu0 %v5756_v2  ;;  %v5817_v17 = vld [vmem:[%s5729_s2 + $0x8] sm:$0xff]  ;;  %v5822_v18 = vld [vmem:[#allocation7] sm:$0xff]  ;;  %p5403_p3 = pnand %p5402_p0, %p6863_p10  ;;  %s5407_s14 = scalar_lea.vmem %s5406_s12, 32 }
  0x80   : > { %4336 = vmatprep.subr.mxu0 %v5760_v3  ;;  %4369 = vmatprep.mubr.msk.f32.mxu1 %vm434_vm0, %v5822_v18  ;;  %v5828_v21 = vld [vmem:[#allocation7 + $0x8] sm:$0xff]  ;;  %v5831_v22 = vld [vmem:[%s5736_s17] sm:$0xff]  ;;  %v667_v29 = vmul.f32 %v5817_v17, %v5817_v17  ;;  %p5408_p9 = scmp.lt.s32.totalorder %s3664_s9, %s5406_s12  ;;  %p5409_p13 = scmp.lt.s32.totalorder %s5407_s14, %s5401_s8 }
  0x81   : > { %4337 = vmatpush3.msra.mxu0 %v5760_v3  ;;  %v5867_v23 = vld [vmem:[%s5736_s17 + $0x8] sm:$0xff]  ;;  %v818_v34 = vmul.f32 %v5831_v22, %v5831_v22  ;;  %v970_v40 = vmul.f32 %v5831_v22, %v5764_v4  ;;  %v6011_v4 = vld [vmem:[%s5729_s2 + $0x10] sm:$0xff]  ;;  %p5404_p11 = pneg %p5403_p3 }
  0x82   : > { %4338 = vmatprep.subr.mxu0 %v5767_v5  ;;  %v819_v35 = vmul.f32 %v5867_v23, %v5867_v23  ;;  %v971_v41 = vmul.f32 %v5867_v23, %v5817_v17  ;;  %p5410_p1 = por %p5409_p13, %p5408_p9 }
  0x83   : > { %4339 = vmatpush3.msra.mxu0 %v5767_v5 }
  0x84   : > { %4340 = vmatprep.subr.mxu0 %v5772_v6  ;;  %p5411_p4 = pnand %p5410_p1, %p5404_p11 }
  0x85   : > { %4341 = vmatpush3.msra.mxu0 %v5772_v6 }
  0x86   : > { %4342 = vmatprep.subr.mxu0 %v5776_v7 }
  0x87   : > { %4343 = vmatpush3.msra.mxu0 %v5776_v7 }
  0x88   : > { %4344 = vmatprep.subr.mxu0 %v5780_v8 }
  0x89   : > { %4345 = vmatpush3.msra.mxu0 %v5780_v8 }
  0x8a   : > { %4346 = vmatprep.subr.mxu0 %v5784_v9 }
  0x8b   : > { %4347 = vmatpush3.msra.mxu0 %v5784_v9 }
  0x8c   : > { %4348 = vmatprep.subr.mxu0 %v5788_v10 }
  0x8d   : > { %4349 = vmatpush3.msra.mxu0 %v5788_v10 }
  0x8e   : > { %4350 = vmatprep.subr.mxu0 %v5792_v11 }
  0x8f   : > { %4351 = vmatpush3.msra.mxu0 %v5792_v11 }
  0x90   : > { %4352 = vmatprep.subr.mxu0 %v5796_v12 }
  0x91   : > { %4353 = vmatpush3.msra.mxu0 %v5796_v12 }
  0x92   : > { %4354 = vmatprep.subr.mxu0 %v5800_v13 }
  0x93   : > { %4355 = vmatpush3.msra.mxu0 %v5800_v13 }
  0x94   : > { %4356 = vmatprep.subr.mxu0 %v5804_v14 }
  0x95   : > { %4357 = vmatpush3.msra.mxu0 %v5804_v14 }
  0x96   : > { %4358 = vmatprep.subr.mxu0 %v5808_v15 }
  0x97   : > { %4359 = vmatpush3.msra.mxu0 %v5808_v15 }
  0x98   : > { %4360 = vmatprep.subr.mxu0 %v5812_v16 }
  0x99   : > { %4361 = vmatpush3.msra.mxu0 %v5812_v16 }
  0x9a   : > { %4363 = vmatmul.mubr.f32.vlgmr.msra.gmra.mxu0 %v5817_v17  ;;  %v6047_v17 = vld [vmem:[%s5729_s2 + $0x18] sm:$0xff] }
  0x9b   : > { %4411 = vmatprep.mubr.msk.f32.mxu0 %vm434_vm0, %v5822_v18 }
 0x15a   : > { %v4364_v19 = vpop.f32.mrf.mxu0 }
 0x15b   : > { %4365 = vmatprep.subr.mxu1 %v4364_v19 }
 0x15c   : > { %v425_v20 = vpop.f32.mrf.mxu0  ;;  %4366 = vmatpush3.msra.mxu1 %v4364_v19 }
 0x15d   : > { %4367 = vmatprep.subr.mxu1 %v425_v20 }
 0x15e   : > { %4368 = vmatpush3.msra.mxu1 %v425_v20 }
 0x15f   : > { %4370 = vmatmul.mubr.msk.f32.vlgmr.msra.gmra.mxu1 %vm434_vm0, %v5828_v21  ;;  %4372 = vmatprep.subr.mxu1 %v5750_v0 }
 0x160   : > { %4373 = vmatpush3.msra.mxu1 %v5750_v0  ;;  %4404 = vmatprep.mubr.f32.mxu1 %v5831_v22 }
 0x161   : > { %4374 = vmatprep.subr.mxu1 %v5752_v1 }
 0x162   : > { %4375 = vmatpush3.msra.mxu1 %v5752_v1 }
 0x163   : > { %4376 = vmatprep.subr.mxu1 %v5756_v2 }
 0x164   : > { %4377 = vmatpush3.msra.mxu1 %v5756_v2 }
 0x165   : > { %4378 = vmatprep.subr.mxu1 %v5760_v3 }
 0x166   : > { %4379 = vmatpush3.msra.mxu1 %v5760_v3 }
 0x167   : > { %4380 = vmatprep.subr.mxu1 %v5767_v5 }
 0x168   : > { %4381 = vmatpush3.msra.mxu1 %v5767_v5 }
 0x169   : > { %4382 = vmatprep.subr.mxu1 %v5772_v6 }
 0x16a   : > { %4383 = vmatpush3.msra.mxu1 %v5772_v6 }
 0x16b   : > { %4384 = vmatprep.subr.mxu1 %v5776_v7 }
 0x16c   : > { %4385 = vmatpush3.msra.mxu1 %v5776_v7 }
 0x16d   : > { %4386 = vmatprep.subr.mxu1 %v5780_v8 }
 0x16e   : > { %4387 = vmatpush3.msra.mxu1 %v5780_v8 }
 0x16f   : > { %4388 = vmatprep.subr.mxu1 %v5784_v9 }
 0x170   : > { %4389 = vmatpush3.msra.mxu1 %v5784_v9 }
 0x171   : > { %4390 = vmatprep.subr.mxu1 %v5788_v10 }
 0x172   : > { %4391 = vmatpush3.msra.mxu1 %v5788_v10 }
 0x173   : > { %4392 = vmatprep.subr.mxu1 %v5792_v11 }
 0x174   : > { %4393 = vmatpush3.msra.mxu1 %v5792_v11 }
 0x175   : > { %4394 = vmatprep.subr.mxu1 %v5796_v12 }
 0x176   : > { %4395 = vmatpush3.msra.mxu1 %v5796_v12 }
 0x177   : > { %4396 = vmatprep.subr.mxu1 %v5800_v13 }
 0x178   : > { %4397 = vmatpush3.msra.mxu1 %v5800_v13 }
 0x179   : > { %4398 = vmatprep.subr.mxu1 %v5804_v14 }
 0x17a   : > { %4399 = vmatpush3.msra.mxu1 %v5804_v14 }
 0x17b   : > { %4400 = vmatprep.subr.mxu1 %v5808_v15 }
 0x17c   : > { %4401 = vmatpush3.msra.mxu1 %v5808_v15 }
 0x17d   : > { %4402 = vmatprep.subr.mxu1 %v5812_v16 }
 0x17e   : > { %4403 = vmatpush3.msra.mxu1 %v5812_v16 }
 0x17f   : > { %4405 = vmatmul.mubr.f32.vlgmr.msra.gmra.mxu1 %v5867_v23 }
 0x180   : > { %4453 = vmatprep.mubr.msk.f32.mxu1 %vm434_vm0, %v5822_v18 }
 0x21f   : > { %v5874_v24 = vpop.f32.mrf.mxu1 }
 0x220   : > { %v1123_v43 = vmul.f32 %v5874_v24, %v5874_v24 }
 0x221   : > { %v5876_v25 = vpop.f32.mrf.mxu1 }
 0x222   : > { %v1122_v46 = vmul.f32 %v5876_v25, %v5876_v25 }
 0x23f   : > { %v4406_v26 = vpop.f32.mrf.mxu1 }
 0x240   : > { %4407 = vmatprep.subr.mxu0 %v4406_v26 }
 0x241   : > { %v582_v27 = vpop.f32.mrf.mxu1  ;;  %4408 = vmatpush3.msra.mxu0 %v4406_v26 }
 0x242   : > { %4409 = vmatprep.subr.mxu0 %v582_v27 }
 0x243   : > { %4410 = vmatpush3.msra.mxu0 %v582_v27 }
 0x244   : > { %4412 = vmatmul.mubr.msk.f32.vlgmr.msra.gmra.mxu0 %vm434_vm0, %v5828_v21  ;;  %4414 = vmatprep.subr.mxu0 %v5750_v0 }
 0x245   : > { %4415 = vmatpush3.msra.mxu0 %v5750_v0  ;;  %4446 = vmatprep.mubr.f32.mxu0 %v666_v28 }
 0x246   : > { %4416 = vmatprep.subr.mxu0 %v5752_v1 }
 0x247   : > { %4417 = vmatpush3.msra.mxu0 %v5752_v1 }
 0x248   : > { %4418 = vmatprep.subr.mxu0 %v5756_v2 }
 0x249   : > { %4419 = vmatpush3.msra.mxu0 %v5756_v2 }
 0x24a   : > { %4420 = vmatprep.subr.mxu0 %v5760_v3 }
 0x24b   : > { %4421 = vmatpush3.msra.mxu0 %v5760_v3 }
 0x24c   : > { %4422 = vmatprep.subr.mxu0 %v5767_v5 }
 0x24d   : > { %4423 = vmatpush3.msra.mxu0 %v5767_v5 }
 0x24e   : > { %4424 = vmatprep.subr.mxu0 %v5772_v6 }
 0x24f   : > { %4425 = vmatpush3.msra.mxu0 %v5772_v6 }
 0x250   : > { %4426 = vmatprep.subr.mxu0 %v5776_v7 }
 0x251   : > { %4427 = vmatpush3.msra.mxu0 %v5776_v7 }
 0x252   : > { %4428 = vmatprep.subr.mxu0 %v5780_v8 }
 0x253   : > { %4429 = vmatpush3.msra.mxu0 %v5780_v8 }
 0x254   : > { %4430 = vmatprep.subr.mxu0 %v5784_v9 }
 0x255   : > { %4431 = vmatpush3.msra.mxu0 %v5784_v9 }
 0x256   : > { %4432 = vmatprep.subr.mxu0 %v5788_v10 }
 0x257   : > { %4433 = vmatpush3.msra.mxu0 %v5788_v10 }
 0x258   : > { %4434 = vmatprep.subr.mxu0 %v5792_v11 }
 0x259   : > { %4435 = vmatpush3.msra.mxu0 %v5792_v11 }
 0x25a   : > { %4436 = vmatprep.subr.mxu0 %v5796_v12 }
 0x25b   : > { %4437 = vmatpush3.msra.mxu0 %v5796_v12 }
 0x25c   : > { %4438 = vmatprep.subr.mxu0 %v5800_v13 }
 0x25d   : > { %4439 = vmatpush3.msra.mxu0 %v5800_v13 }
 0x25e   : > { %4440 = vmatprep.subr.mxu0 %v5804_v14 }
 0x25f   : > { %4441 = vmatpush3.msra.mxu0 %v5804_v14 }
 0x260   : > { %4442 = vmatprep.subr.mxu0 %v5808_v15 }
 0x261   : > { %4443 = vmatpush3.msra.mxu0 %v5808_v15 }
 0x262   : > { %4444 = vmatprep.subr.mxu0 %v5812_v16 }
 0x263   : > { %4445 = vmatpush3.msra.mxu0 %v5812_v16 }
 0x264   : > { %4447 = vmatmul.mubr.f32.vlgmr.msra.gmra.mxu0 %v667_v29 }
 0x265   : > { %4495 = vmatprep.mubr.msk.f32.mxu0 %vm434_vm0, %v5822_v18 }
 0x304   : > { %v5918_v30 = vpop.f32.mrf.mxu0 }
 0x305   : > { %v1125_v42 = vmul.f32 %v5918_v30, %v5918_v30  ;;  %v1127_v20 = vmul.f32 %v5918_v30, %v5874_v24 }
 0x306   : > { %v5920_v31 = vpop.f32.mrf.mxu0 }
 0x307   : > { %v1124_v44 = vmul.f32 %v5920_v31, %v5920_v31  ;;  %v1145_v47 = vadd.f32 %v1125_v42, %v1123_v43  ;;  %v1126_v23 = vmul.f32 %v5920_v31, %v5876_v25  ;;  %v1135_v28 = vmul.f32 2.0, %v1127_v20 }
 0x309   : > { %v1144_v51 = vadd.f32 %v1124_v44, %v1122_v46  ;;  %v1147_v55 = vadd.f32 0.0001, %v1145_v47 }
 0x30b   : > { %v1146_v58 = vadd.f32 0.0001, %v1144_v51 }
 0x324   : > { %v4448_v32 = vpop.f32.mrf.mxu0 }
 0x325   : > { %4449 = vmatprep.subr.mxu1 %v4448_v32 }
 0x326   : > { %v734_v33 = vpop.f32.mrf.mxu0  ;;  %4450 = vmatpush3.msra.mxu1 %v4448_v32 }
 0x327   : > { %4451 = vmatprep.subr.mxu1 %v734_v33 }
 0x328   : > { %4452 = vmatpush3.msra.mxu1 %v734_v33 }
 0x329   : > { %4454 = vmatmul.mubr.msk.f32.vlgmr.msra.gmra.mxu1 %vm434_vm0, %v5828_v21  ;;  %4456 = vmatprep.subr.mxu1 %v5750_v0 }
 0x32a   : > { %4457 = vmatpush3.msra.mxu1 %v5750_v0  ;;  %4488 = vmatprep.mubr.f32.mxu1 %v818_v34  ;;  %v1134_v34 = vmul.f32 2.0, %v1126_v23 }
 0x32b   : > { %4458 = vmatprep.subr.mxu1 %v5752_v1 }
 0x32c   : > { %4459 = vmatpush3.msra.mxu1 %v5752_v1  ;;  %v1136_v24 = vadd.f32 0.0001, %v1134_v34  ;;  %v6254_v34 = vld [vmem:[#allocation8 + $0x70] sm:$0xff] }
 0x32d   : > { %4460 = vmatprep.subr.mxu1 %v5756_v2 }
 0x32e   : > { %4461 = vmatpush3.msra.mxu1 %v5756_v2 }
 0x32f   : > { %4462 = vmatprep.subr.mxu1 %v5760_v3 }
 0x330   : > { %4463 = vmatpush3.msra.mxu1 %v5760_v3 }
 0x331   : > { %4464 = vmatprep.subr.mxu1 %v5767_v5 }
 0x332   : > { %4465 = vmatpush3.msra.mxu1 %v5767_v5 }
 0x333   : > { %4466 = vmatprep.subr.mxu1 %v5772_v6 }
 0x334   : > { %4467 = vmatpush3.msra.mxu1 %v5772_v6 }
 0x335   : > { %4468 = vmatprep.subr.mxu1 %v5776_v7 }
 0x336   : > { %4469 = vmatpush3.msra.mxu1 %v5776_v7 }
 0x337   : > { %4470 = vmatprep.subr.mxu1 %v5780_v8 }
 0x338   : > { %4471 = vmatpush3.msra.mxu1 %v5780_v8 }
 0x339   : > { %4472 = vmatprep.subr.mxu1 %v5784_v9 }
 0x33a   : > { %4473 = vmatpush3.msra.mxu1 %v5784_v9 }
 0x33b   : > { %4474 = vmatprep.subr.mxu1 %v5788_v10 }
 0x33c   : > { %4475 = vmatpush3.msra.mxu1 %v5788_v10 }
 0x33d   : > { %4476 = vmatprep.subr.mxu1 %v5792_v11 }
 0x33e   : > { %4477 = vmatpush3.msra.mxu1 %v5792_v11 }
 0x33f   : > { %4478 = vmatprep.subr.mxu1 %v5796_v12 }
 0x340   : > { %4479 = vmatpush3.msra.mxu1 %v5796_v12 }
 0x341   : > { %4480 = vmatprep.subr.mxu1 %v5800_v13 }
 0x342   : > { %4481 = vmatpush3.msra.mxu1 %v5800_v13 }
 0x343   : > { %4482 = vmatprep.subr.mxu1 %v5804_v14 }
 0x344   : > { %4483 = vmatpush3.msra.mxu1 %v5804_v14 }
 0x345   : > { %4484 = vmatprep.subr.mxu1 %v5808_v15 }
 0x346   : > { %4485 = vmatpush3.msra.mxu1 %v5808_v15 }
 0x347   : > { %4486 = vmatprep.subr.mxu1 %v5812_v16 }
 0x348   : > { %4487 = vmatpush3.msra.mxu1 %v5812_v16 }
 0x349   : > { %4489 = vmatmul.mubr.f32.vlgmr.msra.gmra.mxu1 %v819_v35 }
 0x34a   : > { %4537 = vmatprep.mubr.msk.f32.mxu1 %vm434_vm0, %v5822_v18 }
 0x3e9   : > { %v4455_v36 = vpop.f32.mrf.mxu1 }
 0x3ea   : > { %v1129_v48 = vsub.f32 %v4455_v36, %v1123_v43 }
 0x3eb   : > { %v809_v37 = vpop.f32.mrf.mxu1 }
 0x3ec   : > { %v1128_v52 = vsub.f32 %v809_v37, %v1122_v46 }
 0x409   : > { %v4490_v38 = vpop.f32.mrf.mxu1 }
 0x40a   : > { %4491 = vmatprep.subr.mxu0 %v4490_v38 }
 0x40b   : > { %v886_v39 = vpop.f32.mrf.mxu1  ;;  %4492 = vmatpush3.msra.mxu0 %v4490_v38  ;;  %v1137_v38 = vadd.f32 0.0001, %v1135_v28 }
 0x40c   : > { %4493 = vmatprep.subr.mxu0 %v886_v39 }
 0x40d   : > { %4494 = vmatpush3.msra.mxu0 %v886_v39 }
 0x40e   : > { %4496 = vmatmul.mubr.msk.f32.vlgmr.msra.gmra.mxu0 %vm434_vm0, %v5828_v21  ;;  %4498 = vmatprep.subr.mxu0 %v5750_v0 }
 0x40f   : > { %4499 = vmatpush3.msra.mxu0 %v5750_v0  ;;  %4530 = vmatprep.mubr.f32.mxu0 %v970_v40 }
 0x410   : > { %4500 = vmatprep.subr.mxu0 %v5752_v1 }
 0x411   : > { %4501 = vmatpush3.msra.mxu0 %v5752_v1 }
 0x412   : > { %4502 = vmatprep.subr.mxu0 %v5756_v2 }
 0x413   : > { %4503 = vmatpush3.msra.mxu0 %v5756_v2 }
 0x414   : > { %4504 = vmatprep.subr.mxu0 %v5760_v3 }
 0x415   : > { %4505 = vmatpush3.msra.mxu0 %v5760_v3 }
 0x416   : > { %4506 = vmatprep.subr.mxu0 %v5767_v5 }
 0x417   : > { %4507 = vmatpush3.msra.mxu0 %v5767_v5 }
 0x418   : > { %4508 = vmatprep.subr.mxu0 %v5772_v6 }
 0x419   : > { %4509 = vmatpush3.msra.mxu0 %v5772_v6 }
 0x41a   : > { %4510 = vmatprep.subr.mxu0 %v5776_v7 }
 0x41b   : > { %4511 = vmatpush3.msra.mxu0 %v5776_v7 }
 0x41c   : > { %4512 = vmatprep.subr.mxu0 %v5780_v8 }
 0x41d   : > { %4513 = vmatpush3.msra.mxu0 %v5780_v8 }
 0x41e   : > { %4514 = vmatprep.subr.mxu0 %v5784_v9 }
 0x41f   : > { %4515 = vmatpush3.msra.mxu0 %v5784_v9 }
 0x420   : > { %4516 = vmatprep.subr.mxu0 %v5788_v10 }
 0x421   : > { %4517 = vmatpush3.msra.mxu0 %v5788_v10 }
 0x422   : > { %4518 = vmatprep.subr.mxu0 %v5792_v11 }
 0x423   : > { %4519 = vmatpush3.msra.mxu0 %v5792_v11 }
 0x424   : > { %4520 = vmatprep.subr.mxu0 %v5796_v12 }
 0x425   : > { %4521 = vmatpush3.msra.mxu0 %v5796_v12 }
 0x426   : > { %4522 = vmatprep.subr.mxu0 %v5800_v13 }
 0x427   : > { %4523 = vmatpush3.msra.mxu0 %v5800_v13 }
 0x428   : > { %4524 = vmatprep.subr.mxu0 %v5804_v14 }
 0x429   : > { %4525 = vmatpush3.msra.mxu0 %v5804_v14 }
 0x42a   : > { %4526 = vmatprep.subr.mxu0 %v5808_v15 }
 0x42b   : > { %4527 = vmatpush3.msra.mxu0 %v5808_v15 }
 0x42c   : > { %4528 = vmatprep.subr.mxu0 %v5812_v16 }
 0x42d   : > { %4529 = vmatpush3.msra.mxu0 %v5812_v16 }
 0x42e   : > { %4531 = vmatmul.mubr.f32.vlgmr.msra.gmra.mxu0 %v971_v41 }
 0x42f   : > { %4579 = vmatprep.mubr.msk.f32.mxu0 %vm434_vm0, %v5822_v18 }
 0x4ce   : > { %v4497_v45 = vpop.f32.mrf.mxu0 }
 0x4cf   : > { %v1131_v49 = vsub.f32 %v4497_v45, %v1125_v42 }
 0x4d0   : > { %v961_v50 = vpop.f32.mrf.mxu0 }
 0x4d1   : > { %v1149_v53 = vadd.f32 %v1131_v49, %v1129_v48  ;;  %v1130_v54 = vsub.f32 %v961_v50, %v1124_v44  ;;  %v6061_v49 = vld [vmem:[%s5736_s17 + $0x10] sm:$0xff]  ;;  %v6097_v50 = vld [vmem:[%s5736_s17 + $0x18] sm:$0xff] }
 0x4d3   : > { %v1151_v56 = vadd.f32 0.0009, %v1149_v53  ;;  %v1148_v57 = vadd.f32 %v1130_v54, %v1128_v52 }
 0x4d5   : > { %v1153_v59 = vmul.f32 %v1151_v56, %v1147_v55  ;;  %v1150_v60 = vadd.f32 0.0009, %v1148_v57  ;;  %v1490_v55 = vmul.f32 %v6011_v4, %v6011_v4  ;;  %v1491_v56 = vmul.f32 %v6047_v17, %v6047_v17 }
 0x4d7   : > { %v1152_v61 = vmul.f32 %v1150_v60, %v1146_v58  ;;  %5249 = vrcp.f32 %v1153_v59 }
 0x4d9   : > { %5251 = vrcp.f32 %v1152_v61 }
 0x4e4   : > { %v5250_v19 = vpop.eup %5249 }
 0x4e5   : > { %v1157_v26 = vmul.f32 %v5250_v19, %v1153_v59 }
 0x4e6   : > { %v5252_v22 = vpop.eup %5251 }
 0x4e7   : > { %v1156_v29 = vmul.f32 %v5252_v22, %v1152_v61  ;;  %v1159_v35 = vsub.f32 2.0, %v1157_v26  ;;  %v1642_v61 = vmul.f32 %v6061_v49, %v6061_v49 }
 0x4e9   : > { %v1158_v39 = vsub.f32 2.0, %v1156_v29  ;;  %v1161_v42 = vmul.f32 %v5250_v19, %v1159_v35  ;;  %v6258_v35 = vld [vmem:[#allocation8 + $0x68] sm:$0xff] }
 0x4eb   : > { %v1160_v44 = vmul.f32 %v5252_v22, %v1158_v39  ;;  %v6278_v39 = vld [vmem:[#allocation8 + $0x40] sm:$0xff] }
 0x4ee   : > { %v4532_v62 = vpop.f32.mrf.mxu0 }
 0x4ef   : > { %4533 = vmatprep.subr.mxu1 %v4532_v62 }
 0x4f0   : > { %v1038_v63 = vpop.f32.mrf.mxu0  ;;  %4534 = vmatpush3.msra.mxu1 %v4532_v62  ;;  %v1643_v62 = vmul.f32 %v6097_v50, %v6097_v50 }
 0x4f1   : > { %4535 = vmatprep.subr.mxu1 %v1038_v63 }
 0x4f2   : > { %4536 = vmatpush3.msra.mxu1 %v1038_v63 }
 0x4f3   : > { %4538 = vmatmul.mubr.msk.f32.vlgmr.msra.gmra.mxu1 %vm434_vm0, %v5828_v21  ;;  %4540 = vmatprep.subr.mxu1 %v5750_v0 }
 0x4f4   : > { %4541 = vmatpush3.msra.mxu1 %v5750_v0  ;;  %4572 = vmatprep.mubr.f32.mxu1 %v6011_v4 }
 0x4f5   : > { %4542 = vmatprep.subr.mxu1 %v5752_v1 }
 0x4f6   : > { %4543 = vmatpush3.msra.mxu1 %v5752_v1 }
 0x4f7   : > { %4544 = vmatprep.subr.mxu1 %v5756_v2 }
 0x4f8   : > { %4545 = vmatpush3.msra.mxu1 %v5756_v2 }
 0x4f9   : > { %4546 = vmatprep.subr.mxu1 %v5760_v3 }
 0x4fa   : > { %4547 = vmatpush3.msra.mxu1 %v5760_v3 }
 0x4fb   : > { %4548 = vmatprep.subr.mxu1 %v5767_v5 }
 0x4fc   : > { %4549 = vmatpush3.msra.mxu1 %v5767_v5 }
 0x4fd   : > { %4550 = vmatprep.subr.mxu1 %v5772_v6 }
 0x4fe   : > { %4551 = vmatpush3.msra.mxu1 %v5772_v6 }
 0x4ff   : > { %4552 = vmatprep.subr.mxu1 %v5776_v7 }
 0x500   : > { %4553 = vmatpush3.msra.mxu1 %v5776_v7 }
 0x501   : > { %4554 = vmatprep.subr.mxu1 %v5780_v8 }
 0x502   : > { %4555 = vmatpush3.msra.mxu1 %v5780_v8 }
 0x503   : > { %4556 = vmatprep.subr.mxu1 %v5784_v9 }
 0x504   : > { %4557 = vmatpush3.msra.mxu1 %v5784_v9 }
 0x505   : > { %4558 = vmatprep.subr.mxu1 %v5788_v10 }
 0x506   : > { %4559 = vmatpush3.msra.mxu1 %v5788_v10 }
 0x507   : > { %4560 = vmatprep.subr.mxu1 %v5792_v11 }
 0x508   : > { %4561 = vmatpush3.msra.mxu1 %v5792_v11 }
 0x509   : > { %4562 = vmatprep.subr.mxu1 %v5796_v12 }
 0x50a   : > { %4563 = vmatpush3.msra.mxu1 %v5796_v12 }
 0x50b   : > { %4564 = vmatprep.subr.mxu1 %v5800_v13 }
 0x50c   : > { %4565 = vmatpush3.msra.mxu1 %v5800_v13 }
 0x50d   : > { %4566 = vmatprep.subr.mxu1 %v5804_v14 }
 0x50e   : > { %4567 = vmatpush3.msra.mxu1 %v5804_v14 }
 0x50f   : > { %4568 = vmatprep.subr.mxu1 %v5808_v15 }
 0x510   : > { %4569 = vmatpush3.msra.mxu1 %v5808_v15 }
 0x511   : > { %4570 = vmatprep.subr.mxu1 %v5812_v16 }
 0x512   : > { %4571 = vmatpush3.msra.mxu1 %v5812_v16 }
 0x513   : > { %4573 = vmatmul.mubr.f32.vlgmr.msra.gmra.mxu1 %v6047_v17 }
 0x514   : > { %4621 = vmatprep.mubr.msk.f32.mxu1 %vm434_vm0, %v5822_v18 }
 0x5b3   : > { %v4539_v27 = vpop.f32.mrf.mxu1 }
 0x5b4   : > { %v1133_v32 = vsub.f32 %v4539_v27, %v1127_v20 }
 0x5b5   : > { %v1113_v33 = vpop.f32.mrf.mxu1 }
 0x5b6   : > { %v1139_v36 = vmul.f32 2.0, %v1133_v32  ;;  %v1132_v37 = vsub.f32 %v1113_v33, %v1126_v23  ;;  %v1794_v23 = vmul.f32 %v6061_v49, %v6011_v4  ;;  %v6245_v32 = vld [vmem:[%s5729_s2 + $0x20] sm:$0xff]  ;;  %v6249_v33 = vld [vmem:[#allocation8 + $0x78] sm:$0xff] }
 0x5b8   : > { %v1141_v40 = vadd.f32 0.0009, %v1139_v36  ;;  %v1138_v41 = vmul.f32 2.0, %v1132_v37  ;;  %v6266_v36 = vld [vmem:[#allocation8 + $0x58] sm:$0xff]  ;;  %v6270_v37 = vld [vmem:[#allocation8 + $0x50] sm:$0xff] }
 0x5ba   : > { %v1143_v30 = vmul.f32 %v1141_v40, %v1137_v38  ;;  %v1140_v43 = vadd.f32 0.0009, %v1138_v41  ;;  %v6274_v38 = vld [vmem:[#allocation8 + $0x48] sm:$0xff]  ;;  %v6282_v40 = vld [vmem:[#allocation8 + $0x38] sm:$0xff]  ;;  %v6286_v41 = vld [vmem:[#allocation8 + $0x30] sm:$0xff] }
 0x5bc   : > { %v1163_v25 = vmul.f32 %v1161_v42, %v1143_v30  ;;  %v1142_v31 = vmul.f32 %v1140_v43, %v1136_v24  ;;  %v6290_v24 = vld [vmem:[#allocation8 + $0x28] sm:$0xff]  ;;  %v6294_v30 = vld [vmem:[#allocation8 + $0x20] sm:$0xff]  ;;  %v6298_v42 = vld [vmem:[#allocation8 + $0x18] sm:$0xff] }
 0x5bd   : > { %v6302_v43 = vld [vmem:[#allocation8 + $0x10] sm:$0xff] }
 0x5be   : > { %v1162_v45 = vmul.f32 %v1160_v44, %v1142_v31  ;;  %v6311_v31 = vld [vmem:[%s5729_s2 + $0x28] sm:$0xff]  ;;  %v6313_v44 = vld [vmem:[#allocation8] sm:$0xff] }
 0x5c0   : > { %v6058_v46 = vadd.f32 %v1163_v25, %v1162_v45  ;;  %v6306_v25 = vld [vmem:[#allocation8 + $0x8] sm:$0xff]  ;;  %v6318_v45 = vld [vmem:[#allocation7] sm:$0xff] }
 0x5d3   : > { %v4574_v47 = vpop.f32.mrf.mxu1 }
 0x5d4   : > { %4575 = vmatprep.subr.mxu0 %v4574_v47 }
 0x5d5   : > { %v1256_v48 = vpop.f32.mrf.mxu1  ;;  %4576 = vmatpush3.msra.mxu0 %v4574_v47 }
 0x5d6   : > { %4577 = vmatprep.subr.mxu0 %v1256_v48 }
 0x5d7   : > { %4578 = vmatpush3.msra.mxu0 %v1256_v48 }
 0x5d8   : > { %4580 = vmatmul.mubr.msk.f32.vlgmr.msra.gmra.mxu0 %vm434_vm0, %v5828_v21  ;;  %4582 = vmatprep.subr.mxu0 %v5750_v0 }
 0x5d9   : > { %4583 = vmatpush3.msra.mxu0 %v5750_v0  ;;  %4614 = vmatprep.mubr.f32.mxu0 %v6061_v49 }
 0x5da   : > { %4584 = vmatprep.subr.mxu0 %v5752_v1 }
 0x5db   : > { %4585 = vmatpush3.msra.mxu0 %v5752_v1 }
 0x5dc   : > { %4586 = vmatprep.subr.mxu0 %v5756_v2 }
 0x5dd   : > { %4587 = vmatpush3.msra.mxu0 %v5756_v2 }
 0x5de   : > { %4588 = vmatprep.subr.mxu0 %v5760_v3 }
 0x5df   : > { %4589 = vmatpush3.msra.mxu0 %v5760_v3 }
 0x5e0   : > { %4590 = vmatprep.subr.mxu0 %v5767_v5 }
 0x5e1   : > { %4591 = vmatpush3.msra.mxu0 %v5767_v5 }
 0x5e2   : > { %4592 = vmatprep.subr.mxu0 %v5772_v6 }
 0x5e3   : > { %4593 = vmatpush3.msra.mxu0 %v5772_v6 }
 0x5e4   : > { %4594 = vmatprep.subr.mxu0 %v5776_v7 }
 0x5e5   : > { %4595 = vmatpush3.msra.mxu0 %v5776_v7 }
 0x5e6   : > { %4596 = vmatprep.subr.mxu0 %v5780_v8 }
 0x5e7   : > { %4597 = vmatpush3.msra.mxu0 %v5780_v8 }
 0x5e8   : > { %4598 = vmatprep.subr.mxu0 %v5784_v9 }
 0x5e9   : > { %4599 = vmatpush3.msra.mxu0 %v5784_v9 }
 0x5ea   : > { %4600 = vmatprep.subr.mxu0 %v5788_v10 }
 0x5eb   : > { %4601 = vmatpush3.msra.mxu0 %v5788_v10 }
 0x5ec   : > { %4602 = vmatprep.subr.mxu0 %v5792_v11 }
 0x5ed   : > { %4603 = vmatpush3.msra.mxu0 %v5792_v11 }
 0x5ee   : > { %4604 = vmatprep.subr.mxu0 %v5796_v12 }
 0x5ef   : > { %4605 = vmatpush3.msra.mxu0 %v5796_v12 }
 0x5f0   : > { %4606 = vmatprep.subr.mxu0 %v5800_v13 }
 0x5f1   : > { %4607 = vmatpush3.msra.mxu0 %v5800_v13 }
 0x5f2   : > { %4608 = vmatprep.subr.mxu0 %v5804_v14 }
 0x5f3   : > { %4609 = vmatpush3.msra.mxu0 %v5804_v14 }
 0x5f4   : > { %4610 = vmatprep.subr.mxu0 %v5808_v15 }
 0x5f5   : > { %4611 = vmatpush3.msra.mxu0 %v5808_v15 }
 0x5f6   : > { %4612 = vmatprep.subr.mxu0 %v5812_v16 }
 0x5f7   : > { %4613 = vmatpush3.msra.mxu0 %v5812_v16 }
 0x5f8   : > { %4615 = vmatmul.mubr.f32.vlgmr.msra.gmra.mxu0 %v6097_v50 }
 0x5f9   : > { %4663 = vmatprep.mubr.msk.f32.mxu0 %vm434_vm0, %v5822_v18 }
 0x698   : > { %v6104_v51 = vpop.f32.mrf.mxu0 }
 0x69a   : > { %v6106_v52 = vpop.f32.mrf.mxu0 }
 0x6b8   : > { %v4616_v53 = vpop.f32.mrf.mxu0 }
 0x6b9   : > { %4617 = vmatprep.subr.mxu1 %v4616_v53 }
 0x6ba   : > { %v1406_v54 = vpop.f32.mrf.mxu0  ;;  %4618 = vmatpush3.msra.mxu1 %v4616_v53 }
 0x6bb   : > { %4619 = vmatprep.subr.mxu1 %v1406_v54 }
 0x6bc   : > { %4620 = vmatpush3.msra.mxu1 %v1406_v54 }
 0x6bd   : > { %4622 = vmatmul.mubr.msk.f32.vlgmr.msra.gmra.mxu1 %vm434_vm0, %v5828_v21  ;;  %4624 = vmatprep.subr.mxu1 %v5750_v0 }
 0x6be   : > { %4625 = vmatpush3.msra.mxu1 %v5750_v0  ;;  %4656 = vmatprep.mubr.f32.mxu1 %v1490_v55 }
 0x6bf   : > { %4626 = vmatprep.subr.mxu1 %v5752_v1 }
 0x6c0   : > { %4627 = vmatpush3.msra.mxu1 %v5752_v1 }
 0x6c1   : > { %4628 = vmatprep.subr.mxu1 %v5756_v2 }
 0x6c2   : > { %4629 = vmatpush3.msra.mxu1 %v5756_v2 }
 0x6c3   : > { %4630 = vmatprep.subr.mxu1 %v5760_v3 }
 0x6c4   : > { %4631 = vmatpush3.msra.mxu1 %v5760_v3 }
 0x6c5   : > { %4632 = vmatprep.subr.mxu1 %v5767_v5 }
 0x6c6   : > { %4633 = vmatpush3.msra.mxu1 %v5767_v5 }
 0x6c7   : > { %4634 = vmatprep.subr.mxu1 %v5772_v6 }
 0x6c8   : > { %4635 = vmatpush3.msra.mxu1 %v5772_v6 }
 0x6c9   : > { %4636 = vmatprep.subr.mxu1 %v5776_v7 }
 0x6ca   : > { %4637 = vmatpush3.msra.mxu1 %v5776_v7 }
 0x6cb   : > { %4638 = vmatprep.subr.mxu1 %v5780_v8 }
 0x6cc   : > { %4639 = vmatpush3.msra.mxu1 %v5780_v8 }
 0x6cd   : > { %4640 = vmatprep.subr.mxu1 %v5784_v9 }
 0x6ce   : > { %4641 = vmatpush3.msra.mxu1 %v5784_v9 }
 0x6cf   : > { %4642 = vmatprep.subr.mxu1 %v5788_v10 }
 0x6d0   : > { %4643 = vmatpush3.msra.mxu1 %v5788_v10 }
 0x6d1   : > { %4644 = vmatprep.subr.mxu1 %v5792_v11 }
 0x6d2   : > { %4645 = vmatpush3.msra.mxu1 %v5792_v11 }
 0x6d3   : > { %4646 = vmatprep.subr.mxu1 %v5796_v12 }
 0x6d4   : > { %4647 = vmatpush3.msra.mxu1 %v5796_v12 }
 0x6d5   : > { %4648 = vmatprep.subr.mxu1 %v5800_v13 }
 0x6d6   : > { %4649 = vmatpush3.msra.mxu1 %v5800_v13 }
 0x6d7   : > { %4650 = vmatprep.subr.mxu1 %v5804_v14 }
 0x6d8   : > { %4651 = vmatpush3.msra.mxu1 %v5804_v14 }
 0x6d9   : > { %4652 = vmatprep.subr.mxu1 %v5808_v15 }
 0x6da   : > { %4653 = vmatpush3.msra.mxu1 %v5808_v15 }
 0x6db   : > { %4654 = vmatprep.subr.mxu1 %v5812_v16 }
 0x6dc   : > { %4655 = vmatpush3.msra.mxu1 %v5812_v16 }
 0x6dd   : > { %4657 = vmatmul.mubr.f32.vlgmr.msra.gmra.mxu1 %v1491_v56 }
 0x6de   : > { %4705 = vmatprep.mubr.msk.f32.mxu1 %vm434_vm0, %v5822_v18 }
 0x77d   : > { %v6148_v57 = vpop.f32.mrf.mxu1 }
 0x77e   : > { %v1951_v48 = vmul.f32 %v6148_v57, %v6104_v51 }
 0x77f   : > { %v6150_v58 = vpop.f32.mrf.mxu1 }
 0x780   : > { %v1959_v55 = vmul.f32 2.0, %v1951_v48 }
 0x79d   : > { %v4658_v59 = vpop.f32.mrf.mxu1 }
 0x79e   : > { %4659 = vmatprep.subr.mxu0 %v4658_v59 }
 0x79f   : > { %v1558_v60 = vpop.f32.mrf.mxu1  ;;  %4660 = vmatpush3.msra.mxu0 %v4658_v59 }
 0x7a0   : > { %4661 = vmatprep.subr.mxu0 %v1558_v60 }
 0x7a1   : > { %4662 = vmatpush3.msra.mxu0 %v1558_v60 }
 0x7a2   : > { %4664 = vmatmul.mubr.msk.f32.vlgmr.msra.gmra.mxu0 %vm434_vm0, %v5828_v21  ;;  %4666 = vmatprep.subr.mxu0 %v5750_v0 }
 0x7a3   : > { %4667 = vmatpush3.msra.mxu0 %v5750_v0  ;;  %4698 = vmatprep.mubr.f32.mxu0 %v1642_v61 }
 0x7a4   : > { %4668 = vmatprep.subr.mxu0 %v5752_v1 }
 0x7a5   : > { %4669 = vmatpush3.msra.mxu0 %v5752_v1 }
 0x7a6   : > { %4670 = vmatprep.subr.mxu0 %v5756_v2 }
 0x7a7   : > { %4671 = vmatpush3.msra.mxu0 %v5756_v2 }
 0x7a8   : > { %4672 = vmatprep.subr.mxu0 %v5760_v3 }
 0x7a9   : > { %4673 = vmatpush3.msra.mxu0 %v5760_v3 }
 0x7aa   : > { %4674 = vmatprep.subr.mxu0 %v5767_v5 }
 0x7ab   : > { %4675 = vmatpush3.msra.mxu0 %v5767_v5 }
 0x7ac   : > { %4676 = vmatprep.subr.mxu0 %v5772_v6 }
 0x7ad   : > { %4677 = vmatpush3.msra.mxu0 %v5772_v6 }
 0x7ae   : > { %4678 = vmatprep.subr.mxu0 %v5776_v7 }
 0x7af   : > { %4679 = vmatpush3.msra.mxu0 %v5776_v7 }
 0x7b0   : > { %4680 = vmatprep.subr.mxu0 %v5780_v8 }
 0x7b1   : > { %4681 = vmatpush3.msra.mxu0 %v5780_v8 }
 0x7b2   : > { %4682 = vmatprep.subr.mxu0 %v5784_v9 }
 0x7b3   : > { %4683 = vmatpush3.msra.mxu0 %v5784_v9 }
 0x7b4   : > { %4684 = vmatprep.subr.mxu0 %v5788_v10 }
 0x7b5   : > { %4685 = vmatpush3.msra.mxu0 %v5788_v10 }
 0x7b6   : > { %4686 = vmatprep.subr.mxu0 %v5792_v11 }
 0x7b7   : > { %4687 = vmatpush3.msra.mxu0 %v5792_v11 }
 0x7b8   : > { %4688 = vmatprep.subr.mxu0 %v5796_v12 }
 0x7b9   : > { %4689 = vmatpush3.msra.mxu0 %v5796_v12 }
 0x7ba   : > { %4690 = vmatprep.subr.mxu0 %v5800_v13 }
 0x7bb   : > { %4691 = vmatpush3.msra.mxu0 %v5800_v13 }
 0x7bc   : > { %4692 = vmatprep.subr.mxu0 %v5804_v14 }
 0x7bd   : > { %4693 = vmatpush3.msra.mxu0 %v5804_v14 }
 0x7be   : > { %4694 = vmatprep.subr.mxu0 %v5808_v15 }
 0x7bf   : > { %4695 = vmatpush3.msra.mxu0 %v5808_v15 }
 0x7c0   : > { %4696 = vmatprep.subr.mxu0 %v5812_v16 }
 0x7c1   : > { %4697 = vmatpush3.msra.mxu0 %v5812_v16 }
 0x7c2   : > { %4699 = vmatmul.mubr.f32.vlgmr.msra.gmra.mxu0 %v1643_v62 }
 0x7c3   : > { %4747 = vmatprep.mubr.msk.f32.mxu0 %vm434_vm0, %v5822_v18 }
 0x862   : > { %v4665_v63 = vpop.f32.mrf.mxu0 }
 0x864   : > { %v1633_v19 = vpop.f32.mrf.mxu0 }
 0x882   : > { %v4700_v20 = vpop.f32.mrf.mxu0 }
 0x883   : > { %4701 = vmatprep.subr.mxu1 %v4700_v20 }
 0x884   : > { %v1710_v22 = vpop.f32.mrf.mxu0  ;;  %4702 = vmatpush3.msra.mxu1 %v4700_v20  ;;  %v1165_v20 = vrot.slane %v6058_v46, 4 }
 0x885   : > { %4703 = vmatprep.subr.mxu1 %v1710_v22 }
 0x886   : > { %4704 = vmatpush3.msra.mxu1 %v1710_v22  ;;  %v1961_v22 = vadd.f32 0.0001, %v1959_v55 }
 0x887   : > { %4706 = vmatmul.mubr.msk.f32.vlgmr.msra.gmra.mxu1 %vm434_vm0, %v5828_v21  ;;  %4708 = vmatprep.subr.mxu1 %v5750_v0 }
 0x888   : > { %4709 = vmatpush3.msra.mxu1 %v5750_v0  ;;  %4740 = vmatprep.mubr.f32.mxu1 %v1794_v23  ;;  %v1795_v0 = vmul.f32 %v6097_v50, %v6047_v17  ;;  %v1950_v50 = vmul.f32 %v6150_v58, %v6106_v52 }
 0x889   : > { %4710 = vmatprep.subr.mxu1 %v5752_v1 }
 0x88a   : > { %4711 = vmatpush3.msra.mxu1 %v5752_v1  ;;  %v1949_v1 = vmul.f32 %v6148_v57, %v6148_v57  ;;  %v1958_v61 = vmul.f32 2.0, %v1950_v50 }
 0x88b   : > { %4712 = vmatprep.subr.mxu1 %v5756_v2 }
 0x88c   : > { %4713 = vmatpush3.msra.mxu1 %v5756_v2  ;;  %v1947_v2 = vmul.f32 %v6104_v51, %v6104_v51 }
 0x88d   : > { %4714 = vmatprep.subr.mxu1 %v5760_v3 }
 0x88e   : > { %4715 = vmatpush3.msra.mxu1 %v5760_v3  ;;  %v1948_v3 = vmul.f32 %v6150_v58, %v6150_v58 }
 0x88f   : > { %4716 = vmatprep.subr.mxu1 %v5767_v5 }
 0x890   : > { %4717 = vmatpush3.msra.mxu1 %v5767_v5 }
 0x891   : > { %4718 = vmatprep.subr.mxu1 %v5772_v6 }
 0x892   : > { %4719 = vmatpush3.msra.mxu1 %v5772_v6  ;;  %v1946_v6 = vmul.f32 %v6106_v52, %v6106_v52 }
 0x893   : > { %4720 = vmatprep.subr.mxu1 %v5776_v7 }
 0x894   : > { %4721 = vmatpush3.msra.mxu1 %v5776_v7  ;;  %v1969_v7 = vadd.f32 %v1949_v1, %v1947_v2 }
 0x895   : > { %4722 = vmatprep.subr.mxu1 %v5780_v8 }
 0x896   : > { %4723 = vmatpush3.msra.mxu1 %v5780_v8  ;;  %v1953_v8 = vsub.f32 %v4665_v63, %v1947_v2  ;;  %v1166_v2 = vadd.f32 %v1165_v20, %v6058_v46 }
 0x897   : > { %4724 = vmatprep.subr.mxu1 %v5784_v9 }
 0x898   : > { %4725 = vmatpush3.msra.mxu1 %v5784_v9 }
 0x899   : > { %4726 = vmatprep.subr.mxu1 %v5788_v10 }
 0x89a   : > { %4727 = vmatpush3.msra.mxu1 %v5788_v10 }
 0x89b   : > { %4728 = vmatprep.subr.mxu1 %v5792_v11 }
 0x89c   : > { %4729 = vmatpush3.msra.mxu1 %v5792_v11  ;;  %v1968_v11 = vadd.f32 %v1948_v3, %v1946_v6 }
 0x89d   : > { %4730 = vmatprep.subr.mxu1 %v5796_v12 }
 0x89e   : > { %4731 = vmatpush3.msra.mxu1 %v5796_v12  ;;  %v1952_v12 = vsub.f32 %v1633_v19, %v1946_v6  ;;  %v1970_v4 = vadd.f32 0.0001, %v1968_v11 }
 0x89f   : > { %4732 = vmatprep.subr.mxu1 %v5800_v13 }
 0x8a0   : > { %4733 = vmatpush3.msra.mxu1 %v5800_v13 }
 0x8a1   : > { %4734 = vmatprep.subr.mxu1 %v5804_v14 }
 0x8a2   : > { %4735 = vmatpush3.msra.mxu1 %v5804_v14 }
 0x8a3   : > { %4736 = vmatprep.subr.mxu1 %v5808_v15 }
 0x8a4   : > { %4737 = vmatpush3.msra.mxu1 %v5808_v15  ;;  %v1971_v15 = vadd.f32 0.0001, %v1969_v7 }
 0x8a5   : > { %4738 = vmatprep.subr.mxu1 %v5812_v16 }
 0x8a6   : > { %4739 = vmatpush3.msra.mxu1 %v5812_v16 }
 0x8a7   : > { %4741 = vmatmul.mubr.f32.vlgmr.msra.gmra.mxu1 %v1795_v0  ;;  %v1960_v0 = vadd.f32 0.0001, %v1958_v61 }
 0x8a8   : > { %4789 = vmatprep.mubr.msk.f32.mxu1 %vm434_vm0, %v5822_v18 }
 0x947   : > { %v4707_v5 = vpop.f32.mrf.mxu1 }
 0x948   : > { %v1955_v9 = vsub.f32 %v4707_v5, %v1949_v1 }
 0x949   : > { %v1785_v10 = vpop.f32.mrf.mxu1 }
 0x94a   : > { %v1973_v13 = vadd.f32 %v1955_v9, %v1953_v8  ;;  %v1954_v14 = vsub.f32 %v1785_v10, %v1948_v3  ;;  %v1167_v8 = vrot.slane %v1166_v2, 2 }
 0x94c   : > { %v1975_v16 = vadd.f32 0.0009, %v1973_v13  ;;  %v1972_v18 = vadd.f32 %v1954_v14, %v1952_v12  ;;  %v1168_v11 = vadd.f32 %v1167_v8, %v1166_v2 }
 0x94e   : > { %v6240_v17 = vmul.f32 %v1975_v16, %v1971_v15  ;;  %v1974_v26 = vadd.f32 0.0009, %v1972_v18  ;;  %v1169_v14 = vrot.slane %v1168_v11, 1 }
 0x950   : > { %v6242_v27 = vmul.f32 %v1974_v26, %v1970_v4  ;;  %5253 = vrcp.f32 %v6240_v17  ;;  %v1170_v18 = vadd.f32 %v1169_v14, %v1168_v11 }
 0x952   : > { %5255 = vrcp.f32 %v6242_v27 }
 0x95d   : > { %v5254_v47 = vpop.eup %5253 }
 0x95e   : > { %v1981_v53 = vmul.f32 %v5254_v47, %v6240_v17 }
 0x95f   : > { %v5256_v49 = vpop.eup %5255 }
 0x960   : > { %v1980_v56 = vmul.f32 %v5256_v49, %v6242_v27  ;;  %v1983_v62 = vsub.f32 2.0, %v1981_v53  ;;  %v6335_v27 = vld [vmem:[%s5736_s17 + $0x20] sm:$0xff]  ;;  %v2314_v53 = vmul.f32 %v6245_v32, %v6245_v32 }
 0x961   : > { %v2466_v61 = vmul.f32 %v6335_v27, %v6335_v27 }
 0x962   : > { %v1982_v51 = vsub.f32 2.0, %v1980_v56  ;;  %v1985_v58 = vmul.f32 %v5254_v47, %v1983_v62 }
 0x964   : > { %v1984_v6 = vmul.f32 %v5256_v49, %v1982_v51  ;;  %v2618_v51 = vmul.f32 %v6335_v27, %v6245_v32 }
 0x967   : > { %v4742_v28 = vpop.f32.mrf.mxu1 }
 0x968   : > { %4743 = vmatprep.subr.mxu0 %v4742_v28 }
 0x969   : > { %v1862_v29 = vpop.f32.mrf.mxu1  ;;  %4744 = vmatpush3.msra.mxu0 %v4742_v28  ;;  %v6337_v28 = vld [vmem:[#allocation7 + $0x8] sm:$0xff] }
 0x96a   : > { %4745 = vmatprep.subr.mxu0 %v1862_v29 }
 0x96b   : > { %4746 = vmatpush3.msra.mxu0 %v1862_v29  ;;  %v6373_v29 = vld [vmem:[%s5736_s17 + $0x28] sm:$0xff] }
 0x96c   : > { %4748 = vmatmul.mubr.msk.f32.vlgmr.msra.gmra.mxu0 %vm434_vm0, %v5828_v21  ;;  %4750 = vmatprep.subr.mxu0 %v6249_v33  ;;  %v6262_v21 = vld [vmem:[#allocation8 + $0x60] sm:$0xff]  ;;  %v2467_v62 = vmul.f32 %v6373_v29, %v6373_v29 }
 0x96d   : > { %4751 = vmatpush3.msra.mxu0 %v6249_v33  ;;  %4782 = vmatprep.mubr.f32.mxu0 %v6245_v32  ;;  %v2619_v32 = vmul.f32 %v6373_v29, %v6311_v31 }
 0x96e   : > { %4752 = vmatprep.subr.mxu0 %v6254_v34 }
 0x96f   : > { %4753 = vmatpush3.msra.mxu0 %v6254_v34 }
 0x970   : > { %4754 = vmatprep.subr.mxu0 %v6258_v35 }
 0x971   : > { %4755 = vmatpush3.msra.mxu0 %v6258_v35 }
 0x972   : > { %4756 = vmatprep.subr.mxu0 %v6262_v21 }
 0x973   : > { %4757 = vmatpush3.msra.mxu0 %v6262_v21 }
 0x974   : > { %4758 = vmatprep.subr.mxu0 %v6266_v36 }
 0x975   : > { %4759 = vmatpush3.msra.mxu0 %v6266_v36 }
 0x976   : > { %4760 = vmatprep.subr.mxu0 %v6270_v37 }
 0x977   : > { %4761 = vmatpush3.msra.mxu0 %v6270_v37 }
 0x978   : > { %4762 = vmatprep.subr.mxu0 %v6274_v38 }
 0x979   : > { %4763 = vmatpush3.msra.mxu0 %v6274_v38 }
 0x97a   : > { %4764 = vmatprep.subr.mxu0 %v6278_v39 }
 0x97b   : > { %4765 = vmatpush3.msra.mxu0 %v6278_v39 }
 0x97c   : > { %4766 = vmatprep.subr.mxu0 %v6282_v40 }
 0x97d   : > { %4767 = vmatpush3.msra.mxu0 %v6282_v40 }
 0x97e   : > { %4768 = vmatprep.subr.mxu0 %v6286_v41 }
 0x97f   : > { %4769 = vmatpush3.msra.mxu0 %v6286_v41 }
 0x980   : > { %4770 = vmatprep.subr.mxu0 %v6290_v24 }
 0x981   : > { %4771 = vmatpush3.msra.mxu0 %v6290_v24 }
 0x982   : > { %4772 = vmatprep.subr.mxu0 %v6294_v30 }
 0x983   : > { %4773 = vmatpush3.msra.mxu0 %v6294_v30 }
 0x984   : > { %4774 = vmatprep.subr.mxu0 %v6298_v42 }
 0x985   : > { %4775 = vmatpush3.msra.mxu0 %v6298_v42 }
 0x986   : > { %4776 = vmatprep.subr.mxu0 %v6302_v43 }
 0x987   : > { %4777 = vmatpush3.msra.mxu0 %v6302_v43 }
 0x988   : > { %4778 = vmatprep.subr.mxu0 %v6306_v25 }
 0x989   : > { %4779 = vmatpush3.msra.mxu0 %v6306_v25 }
 0x98a   : > { %4780 = vmatprep.subr.mxu0 %v6313_v44 }
 0x98b   : > { %4781 = vmatpush3.msra.mxu0 %v6313_v44 }
 0x98c   : > { %4783 = vmatmul.mubr.f32.vlgmr.msra.gmra.mxu0 %v6311_v31 }
 0x98d   : > { %4831 = vmatprep.mubr.msk.f32.mxu0 %vm434_vm0, %v6318_v45 }
 0xa2c   : > { %v4749_v54 = vpop.f32.mrf.mxu0 }
 0xa2d   : > { %v1957_v59 = vsub.f32 %v4749_v54, %v1951_v48  ;;  %v2315_v54 = vmul.f32 %v6311_v31, %v6311_v31 }
 0xa2e   : > { %v1937_v60 = vpop.f32.mrf.mxu0 }
 0xa2f   : > { %v1963_v63 = vmul.f32 2.0, %v1957_v59  ;;  %v1956_v19 = vsub.f32 %v1937_v60, %v1950_v50 }
 0xa31   : > { %v1965_v57 = vadd.f32 0.0009, %v1963_v63  ;;  %v1962_v23 = vmul.f32 2.0, %v1956_v19 }
 0xa33   : > { %v1967_v52 = vmul.f32 %v1965_v57, %v1961_v22  ;;  %v1964_v1 = vadd.f32 0.0009, %v1962_v23 }
 0xa35   : > { %v1987_v3 = vmul.f32 %v1985_v58, %v1967_v52  ;;  %v1966_v5 = vmul.f32 %v1964_v1, %v1960_v0 }
 0xa37   : > { %v1986_v7 = vmul.f32 %v1984_v6, %v1966_v5 }
 0xa39   : > { %v1988_v9 = vadd.f32 %v1987_v3, %v1986_v7 }
 0xa3b   : > { %v1989_v10 = vrot.slane %v1988_v9, 4 }
 0xa3d   : > { %v1990_v12 = vadd.f32 %v1989_v10, %v1988_v9 }
 0xa3f   : > { %v1991_v13 = vrot.slane %v1990_v12, 2 }
 0xa41   : > { %v1992_v15 = vadd.f32 %v1991_v13, %v1990_v12 }
 0xa43   : > { %v1993_v16 = vrot.slane %v1992_v15, 1 }
 0xa45   : > { %v1994_v4 = vadd.f32 %v1993_v16, %v1992_v15 }
 0xa47   : > { %v6332_v17 = vadd.f32 %v1994_v4, %v1170_v18  ;;  %v6517_v4 = vld [vmem:[%s5729_s2 + $0x30] sm:$0xff] }
 0xa4c   : > { %v4784_v26 = vpop.f32.mrf.mxu0 }
 0xa4d   : > { %4785 = vmatprep.subr.mxu1 %v4784_v26 }
 0xa4e   : > { %v2080_v46 = vpop.f32.mrf.mxu0  ;;  %4786 = vmatpush3.msra.mxu1 %v4784_v26  ;;  %v6553_v26 = vld [vmem:[%s5729_s2 + $0x38] sm:$0xff] }
 0xa4f   : > { %4787 = vmatprep.subr.mxu1 %v2080_v46 }
 0xa50   : > { %4788 = vmatpush3.msra.mxu1 %v2080_v46 }
 0xa51   : > { %4790 = vmatmul.mubr.msk.f32.vlgmr.msra.gmra.mxu1 %vm434_vm0, %v6337_v28  ;;  %4792 = vmatprep.subr.mxu1 %v6249_v33 }
 0xa52   : > { %4793 = vmatpush3.msra.mxu1 %v6249_v33  ;;  %4824 = vmatprep.mubr.f32.mxu1 %v6335_v27 }
 0xa53   : > { %4794 = vmatprep.subr.mxu1 %v6254_v34 }
 0xa54   : > { %4795 = vmatpush3.msra.mxu1 %v6254_v34 }
 0xa55   : > { %4796 = vmatprep.subr.mxu1 %v6258_v35 }
 0xa56   : > { %4797 = vmatpush3.msra.mxu1 %v6258_v35 }
 0xa57   : > { %4798 = vmatprep.subr.mxu1 %v6262_v21 }
 0xa58   : > { %4799 = vmatpush3.msra.mxu1 %v6262_v21 }
 0xa59   : > { %4800 = vmatprep.subr.mxu1 %v6266_v36 }
 0xa5a   : > { %4801 = vmatpush3.msra.mxu1 %v6266_v36 }
 0xa5b   : > { %4802 = vmatprep.subr.mxu1 %v6270_v37 }
 0xa5c   : > { %4803 = vmatpush3.msra.mxu1 %v6270_v37 }
 0xa5d   : > { %4804 = vmatprep.subr.mxu1 %v6274_v38 }
 0xa5e   : > { %4805 = vmatpush3.msra.mxu1 %v6274_v38 }
 0xa5f   : > { %4806 = vmatprep.subr.mxu1 %v6278_v39 }
 0xa60   : > { %4807 = vmatpush3.msra.mxu1 %v6278_v39 }
 0xa61   : > { %4808 = vmatprep.subr.mxu1 %v6282_v40 }
 0xa62   : > { %4809 = vmatpush3.msra.mxu1 %v6282_v40 }
 0xa63   : > { %4810 = vmatprep.subr.mxu1 %v6286_v41 }
 0xa64   : > { %4811 = vmatpush3.msra.mxu1 %v6286_v41 }
 0xa65   : > { %4812 = vmatprep.subr.mxu1 %v6290_v24 }
 0xa66   : > { %4813 = vmatpush3.msra.mxu1 %v6290_v24 }
 0xa67   : > { %4814 = vmatprep.subr.mxu1 %v6294_v30 }
 0xa68   : > { %4815 = vmatpush3.msra.mxu1 %v6294_v30 }
 0xa69   : > { %4816 = vmatprep.subr.mxu1 %v6298_v42 }
 0xa6a   : > { %4817 = vmatpush3.msra.mxu1 %v6298_v42 }
 0xa6b   : > { %4818 = vmatprep.subr.mxu1 %v6302_v43 }
 0xa6c   : > { %4819 = vmatpush3.msra.mxu1 %v6302_v43 }
 0xa6d   : > { %4820 = vmatprep.subr.mxu1 %v6306_v25 }
 0xa6e   : > { %4821 = vmatpush3.msra.mxu1 %v6306_v25 }
 0xa6f   : > { %4822 = vmatprep.subr.mxu1 %v6313_v44 }
 0xa70   : > { %4823 = vmatpush3.msra.mxu1 %v6313_v44 }
 0xa71   : > { %4825 = vmatmul.mubr.f32.vlgmr.msra.gmra.mxu1 %v6373_v29 }
 0xa72   : > { %4873 = vmatprep.mubr.msk.f32.mxu1 %vm434_vm0, %v6318_v45 }
 0xb11   : > { %v6380_v47 = vpop.f32.mrf.mxu1 }
 0xb12   : > { %v2771_v23 = vmul.f32 %v6380_v47, %v6380_v47 }
 0xb13   : > { %v6382_v48 = vpop.f32.mrf.mxu1 }
 0xb14   : > { %v2770_v52 = vmul.f32 %v6382_v48, %v6382_v48 }
 0xb31   : > { %v4826_v49 = vpop.f32.mrf.mxu1 }
 0xb32   : > { %4827 = vmatprep.subr.mxu0 %v4826_v49 }
 0xb33   : > { %v2230_v50 = vpop.f32.mrf.mxu1  ;;  %4828 = vmatpush3.msra.mxu0 %v4826_v49 }
 0xb34   : > { %4829 = vmatprep.subr.mxu0 %v2230_v50 }
 0xb35   : > { %4830 = vmatpush3.msra.mxu0 %v2230_v50 }
 0xb36   : > { %4832 = vmatmul.mubr.msk.f32.vlgmr.msra.gmra.mxu0 %vm434_vm0, %v6337_v28  ;;  %4834 = vmatprep.subr.mxu0 %v6249_v33 }
 0xb37   : > { %4835 = vmatpush3.msra.mxu0 %v6249_v33  ;;  %4866 = vmatprep.mubr.f32.mxu0 %v2314_v53 }
 0xb38   : > { %4836 = vmatprep.subr.mxu0 %v6254_v34 }
 0xb39   : > { %4837 = vmatpush3.msra.mxu0 %v6254_v34 }
 0xb3a   : > { %4838 = vmatprep.subr.mxu0 %v6258_v35 }
 0xb3b   : > { %4839 = vmatpush3.msra.mxu0 %v6258_v35 }
 0xb3c   : > { %4840 = vmatprep.subr.mxu0 %v6262_v21 }
 0xb3d   : > { %4841 = vmatpush3.msra.mxu0 %v6262_v21 }
 0xb3e   : > { %4842 = vmatprep.subr.mxu0 %v6266_v36 }
 0xb3f   : > { %4843 = vmatpush3.msra.mxu0 %v6266_v36 }
 0xb40   : > { %4844 = vmatprep.subr.mxu0 %v6270_v37 }
 0xb41   : > { %4845 = vmatpush3.msra.mxu0 %v6270_v37 }
 0xb42   : > { %4846 = vmatprep.subr.mxu0 %v6274_v38 }
 0xb43   : > { %4847 = vmatpush3.msra.mxu0 %v6274_v38 }
 0xb44   : > { %4848 = vmatprep.subr.mxu0 %v6278_v39 }
 0xb45   : > { %4849 = vmatpush3.msra.mxu0 %v6278_v39 }
 0xb46   : > { %4850 = vmatprep.subr.mxu0 %v6282_v40 }
 0xb47   : > { %4851 = vmatpush3.msra.mxu0 %v6282_v40 }
 0xb48   : > { %4852 = vmatprep.subr.mxu0 %v6286_v41 }
 0xb49   : > { %4853 = vmatpush3.msra.mxu0 %v6286_v41 }
 0xb4a   : > { %4854 = vmatprep.subr.mxu0 %v6290_v24 }
 0xb4b   : > { %4855 = vmatpush3.msra.mxu0 %v6290_v24 }
 0xb4c   : > { %4856 = vmatprep.subr.mxu0 %v6294_v30 }
 0xb4d   : > { %4857 = vmatpush3.msra.mxu0 %v6294_v30 }
 0xb4e   : > { %4858 = vmatprep.subr.mxu0 %v6298_v42 }
 0xb4f   : > { %4859 = vmatpush3.msra.mxu0 %v6298_v42 }
 0xb50   : > { %4860 = vmatprep.subr.mxu0 %v6302_v43 }
 0xb51   : > { %4861 = vmatpush3.msra.mxu0 %v6302_v43 }
 0xb52   : > { %4862 = vmatprep.subr.mxu0 %v6306_v25 }
 0xb53   : > { %4863 = vmatpush3.msra.mxu0 %v6306_v25 }
 0xb54   : > { %4864 = vmatprep.subr.mxu0 %v6313_v44 }
 0xb55   : > { %4865 = vmatpush3.msra.mxu0 %v6313_v44 }
 0xb56   : > { %4867 = vmatmul.mubr.f32.vlgmr.msra.gmra.mxu0 %v2315_v54 }
 0xb57   : > { %4915 = vmatprep.mubr.msk.f32.mxu0 %vm434_vm0, %v6318_v45 }
 0xbf6   : > { %v6424_v55 = vpop.f32.mrf.mxu0 }
 0xbf7   : > { %v2773_v57 = vmul.f32 %v6424_v55, %v6424_v55  ;;  %v2775_v49 = vmul.f32 %v6424_v55, %v6380_v47 }
 0xbf8   : > { %v6426_v56 = vpop.f32.mrf.mxu0 }
 0xbf9   : > { %v2772_v0 = vmul.f32 %v6426_v56, %v6426_v56  ;;  %v2793_v58 = vadd.f32 %v2773_v57, %v2771_v23  ;;  %v2774_v53 = vmul.f32 %v6426_v56, %v6382_v48 }
 0xbfb   : > { %v2792_v5 = vadd.f32 %v2772_v0, %v2770_v52  ;;  %v2795_v9 = vadd.f32 0.0001, %v2793_v58 }
 0xbfd   : > { %v2794_v12 = vadd.f32 0.0001, %v2792_v5 }
 0xc16   : > { %v4868_v59 = vpop.f32.mrf.mxu0 }
 0xc17   : > { %4869 = vmatprep.subr.mxu1 %v4868_v59 }
 0xc18   : > { %v2382_v60 = vpop.f32.mrf.mxu0  ;;  %4870 = vmatpush3.msra.mxu1 %v4868_v59 }
 0xc19   : > { %4871 = vmatprep.subr.mxu1 %v2382_v60 }
 0xc1a   : > { %4872 = vmatpush3.msra.mxu1 %v2382_v60  ;;  %v2783_v60 = vmul.f32 2.0, %v2775_v49 }
 0xc1b   : > { %4874 = vmatmul.mubr.msk.f32.vlgmr.msra.gmra.mxu1 %vm434_vm0, %v6337_v28  ;;  %4876 = vmatprep.subr.mxu1 %v6249_v33 }
 0xc1c   : > { %4877 = vmatpush3.msra.mxu1 %v6249_v33  ;;  %4908 = vmatprep.mubr.f32.mxu1 %v2466_v61 }
 0xc1d   : > { %4878 = vmatprep.subr.mxu1 %v6254_v34 }
 0xc1e   : > { %4879 = vmatpush3.msra.mxu1 %v6254_v34 }
 0xc1f   : > { %4880 = vmatprep.subr.mxu1 %v6258_v35 }
 0xc20   : > { %4881 = vmatpush3.msra.mxu1 %v6258_v35 }
 0xc21   : > { %4882 = vmatprep.subr.mxu1 %v6262_v21 }
 0xc22   : > { %4883 = vmatpush3.msra.mxu1 %v6262_v21 }
 0xc23   : > { %4884 = vmatprep.subr.mxu1 %v6266_v36 }
 0xc24   : > { %4885 = vmatpush3.msra.mxu1 %v6266_v36 }
 0xc25   : > { %4886 = vmatprep.subr.mxu1 %v6270_v37 }
 0xc26   : > { %4887 = vmatpush3.msra.mxu1 %v6270_v37 }
 0xc27   : > { %4888 = vmatprep.subr.mxu1 %v6274_v38 }
 0xc28   : > { %4889 = vmatpush3.msra.mxu1 %v6274_v38 }
 0xc29   : > { %4890 = vmatprep.subr.mxu1 %v6278_v39 }
 0xc2a   : > { %4891 = vmatpush3.msra.mxu1 %v6278_v39 }
 0xc2b   : > { %4892 = vmatprep.subr.mxu1 %v6282_v40 }
 0xc2c   : > { %4893 = vmatpush3.msra.mxu1 %v6282_v40 }
 0xc2d   : > { %4894 = vmatprep.subr.mxu1 %v6286_v41 }
 0xc2e   : > { %4895 = vmatpush3.msra.mxu1 %v6286_v41 }
 0xc2f   : > { %4896 = vmatprep.subr.mxu1 %v6290_v24 }
 0xc30   : > { %4897 = vmatpush3.msra.mxu1 %v6290_v24 }
 0xc31   : > { %4898 = vmatprep.subr.mxu1 %v6294_v30 }
 0xc32   : > { %4899 = vmatpush3.msra.mxu1 %v6294_v30 }
 0xc33   : > { %4900 = vmatprep.subr.mxu1 %v6298_v42 }
 0xc34   : > { %4901 = vmatpush3.msra.mxu1 %v6298_v42 }
 0xc35   : > { %4902 = vmatprep.subr.mxu1 %v6302_v43 }
 0xc36   : > { %4903 = vmatpush3.msra.mxu1 %v6302_v43 }
 0xc37   : > { %4904 = vmatprep.subr.mxu1 %v6306_v25 }
 0xc38   : > { %4905 = vmatpush3.msra.mxu1 %v6306_v25 }
 0xc39   : > { %4906 = vmatprep.subr.mxu1 %v6313_v44 }
 0xc3a   : > { %4907 = vmatpush3.msra.mxu1 %v6313_v44 }
 0xc3b   : > { %4909 = vmatmul.mubr.f32.vlgmr.msra.gmra.mxu1 %v2467_v62 }
 0xc3c   : > { %4957 = vmatprep.mubr.msk.f32.mxu1 %vm434_vm0, %v6318_v45 }
 0xcdb   : > { %v4875_v63 = vpop.f32.mrf.mxu1 }
 0xcdc   : > { %v2777_v1 = vsub.f32 %v4875_v63, %v2771_v23 }
 0xcdd   : > { %v2457_v19 = vpop.f32.mrf.mxu1 }
 0xcde   : > { %v2776_v6 = vsub.f32 %v2457_v19, %v2770_v52  ;;  %v2782_v19 = vmul.f32 2.0, %v2774_v53 }
 0xcfb   : > { %v4910_v20 = vpop.f32.mrf.mxu1 }
 0xcfc   : > { %4911 = vmatprep.subr.mxu0 %v4910_v20 }
 0xcfd   : > { %v2534_v22 = vpop.f32.mrf.mxu1  ;;  %4912 = vmatpush3.msra.mxu0 %v4910_v20 }
 0xcfe   : > { %4913 = vmatprep.subr.mxu0 %v2534_v22 }
 0xcff   : > { %4914 = vmatpush3.msra.mxu0 %v2534_v22 }
 0xd00   : > { %4916 = vmatmul.mubr.msk.f32.vlgmr.msra.gmra.mxu0 %vm434_vm0, %v6337_v28  ;;  %4918 = vmatprep.subr.mxu0 %v6249_v33 }
 0xd01   : > { %4919 = vmatpush3.msra.mxu0 %v6249_v33  ;;  %4950 = vmatprep.mubr.f32.mxu0 %v2618_v51 }
 0xd02   : > { %4920 = vmatprep.subr.mxu0 %v6254_v34 }
 0xd03   : > { %4921 = vmatpush3.msra.mxu0 %v6254_v34 }
 0xd04   : > { %4922 = vmatprep.subr.mxu0 %v6258_v35 }
 0xd05   : > { %4923 = vmatpush3.msra.mxu0 %v6258_v35 }
 0xd06   : > { %4924 = vmatprep.subr.mxu0 %v6262_v21 }
 0xd07   : > { %4925 = vmatpush3.msra.mxu0 %v6262_v21 }
 0xd08   : > { %4926 = vmatprep.subr.mxu0 %v6266_v36 }
 0xd09   : > { %4927 = vmatpush3.msra.mxu0 %v6266_v36 }
 0xd0a   : > { %4928 = vmatprep.subr.mxu0 %v6270_v37 }
 0xd0b   : > { %4929 = vmatpush3.msra.mxu0 %v6270_v37 }
 0xd0c   : > { %4930 = vmatprep.subr.mxu0 %v6274_v38 }
 0xd0d   : > { %4931 = vmatpush3.msra.mxu0 %v6274_v38 }
 0xd0e   : > { %4932 = vmatprep.subr.mxu0 %v6278_v39 }
 0xd0f   : > { %4933 = vmatpush3.msra.mxu0 %v6278_v39 }
 0xd10   : > { %4934 = vmatprep.subr.mxu0 %v6282_v40 }
 0xd11   : > { %4935 = vmatpush3.msra.mxu0 %v6282_v40 }
 0xd12   : > { %4936 = vmatprep.subr.mxu0 %v6286_v41 }
 0xd13   : > { %4937 = vmatpush3.msra.mxu0 %v6286_v41 }
 0xd14   : > { %4938 = vmatprep.subr.mxu0 %v6290_v24 }
 0xd15   : > { %4939 = vmatpush3.msra.mxu0 %v6290_v24 }
 0xd16   : > { %4940 = vmatprep.subr.mxu0 %v6294_v30 }
 0xd17   : > { %4941 = vmatpush3.msra.mxu0 %v6294_v30 }
 0xd18   : > { %4942 = vmatprep.subr.mxu0 %v6298_v42 }
 0xd19   : > { %4943 = vmatpush3.msra.mxu0 %v6298_v42 }
 0xd1a   : > { %4944 = vmatprep.subr.mxu0 %v6302_v43 }
 0xd1b   : > { %4945 = vmatpush3.msra.mxu0 %v6302_v43 }
 0xd1c   : > { %4946 = vmatprep.subr.mxu0 %v6306_v25 }
 0xd1d   : > { %4947 = vmatpush3.msra.mxu0 %v6306_v25 }
 0xd1e   : > { %4948 = vmatprep.subr.mxu0 %v6313_v44 }
 0xd1f   : > { %4949 = vmatpush3.msra.mxu0 %v6313_v44 }
 0xd20   : > { %4951 = vmatmul.mubr.f32.vlgmr.msra.gmra.mxu0 %v2619_v32  ;;  %v2785_v32 = vadd.f32 0.0001, %v2783_v60 }
 0xd21   : > { %4999 = vmatprep.mubr.msk.f32.mxu0 %vm434_vm0, %v6318_v45 }
 0xdc0   : > { %v4917_v31 = vpop.f32.mrf.mxu0 }
 0xdc1   : > { %v2779_v2 = vsub.f32 %v4917_v31, %v2773_v57  ;;  %v2784_v31 = vadd.f32 0.0001, %v2782_v19 }
 0xdc2   : > { %v2609_v3 = vpop.f32.mrf.mxu0 }
 0xdc3   : > { %v2797_v7 = vadd.f32 %v2779_v2, %v2777_v1  ;;  %v2778_v8 = vsub.f32 %v2609_v3, %v2772_v0 }
 0xdc5   : > { %v2799_v10 = vadd.f32 0.0009, %v2797_v7  ;;  %v2796_v11 = vadd.f32 %v2778_v8, %v2776_v6 }
 0xdc7   : > { %v2801_v13 = vmul.f32 %v2799_v10, %v2795_v9  ;;  %v2798_v14 = vadd.f32 0.0009, %v2796_v11 }
 0xdc9   : > { %v2800_v15 = vmul.f32 %v2798_v14, %v2794_v12  ;;  %5257 = vrcp.f32 %v2801_v13 }
 0xdcb   : > { %5259 = vrcp.f32 %v2800_v15 }
 0xdd6   : > { %v5258_v46 = vpop.eup %5257 }
 0xdd7   : > { %v2805_v54 = vmul.f32 %v5258_v46, %v2801_v13  ;;  %v6568_v13 = vld [vmem:[%s5736_s17 + $0x30] sm:$0xff] }
 0xdd8   : > { %v5260_v50 = vpop.eup %5259  ;;  %v3290_v60 = vmul.f32 %v6568_v13, %v6568_v13 }
 0xdd9   : > { %v2804_v61 = vmul.f32 %v5260_v50, %v2800_v15  ;;  %v2807_v20 = vsub.f32 2.0, %v2805_v54 }
 0xddb   : > { %v2806_v57 = vsub.f32 2.0, %v2804_v61  ;;  %v2809_v55 = vmul.f32 %v5258_v46, %v2807_v20  ;;  %v3138_v46 = vmul.f32 %v6517_v4, %v6517_v4 }
 0xddd   : > { %v2808_v56 = vmul.f32 %v5260_v50, %v2806_v57 }
 0xde0   : > { %v4952_v16 = vpop.f32.mrf.mxu0 }
 0xde1   : > { %4953 = vmatprep.subr.mxu1 %v4952_v16 }
 0xde2   : > { %v2686_v18 = vpop.f32.mrf.mxu0  ;;  %4954 = vmatpush3.msra.mxu1 %v4952_v16 }
 0xde3   : > { %4955 = vmatprep.subr.mxu1 %v2686_v18 }
 0xde4   : > { %4956 = vmatpush3.msra.mxu1 %v2686_v18 }
 0xde5   : > { %4958 = vmatmul.mubr.msk.f32.vlgmr.msra.gmra.mxu1 %vm434_vm0, %v6337_v28  ;;  %4960 = vmatprep.subr.mxu1 %v6249_v33 }
 0xde6   : > { %4961 = vmatpush3.msra.mxu1 %v6249_v33  ;;  %4992 = vmatprep.mubr.f32.mxu1 %v6517_v4 }
 0xde7   : > { %4962 = vmatprep.subr.mxu1 %v6254_v34 }
 0xde8   : > { %4963 = vmatpush3.msra.mxu1 %v6254_v34 }
 0xde9   : > { %4964 = vmatprep.subr.mxu1 %v6258_v35 }
 0xdea   : > { %4965 = vmatpush3.msra.mxu1 %v6258_v35 }
 0xdeb   : > { %4966 = vmatprep.subr.mxu1 %v6262_v21 }
 0xdec   : > { %4967 = vmatpush3.msra.mxu1 %v6262_v21 }
 0xded   : > { %4968 = vmatprep.subr.mxu1 %v6266_v36 }
 0xdee   : > { %4969 = vmatpush3.msra.mxu1 %v6266_v36 }
 0xdef   : > { %4970 = vmatprep.subr.mxu1 %v6270_v37 }
 0xdf0   : > { %4971 = vmatpush3.msra.mxu1 %v6270_v37 }
 0xdf1   : > { %4972 = vmatprep.subr.mxu1 %v6274_v38 }
 0xdf2   : > { %4973 = vmatpush3.msra.mxu1 %v6274_v38 }
 0xdf3   : > { %4974 = vmatprep.subr.mxu1 %v6278_v39 }
 0xdf4   : > { %4975 = vmatpush3.msra.mxu1 %v6278_v39 }
 0xdf5   : > { %4976 = vmatprep.subr.mxu1 %v6282_v40 }
 0xdf6   : > { %4977 = vmatpush3.msra.mxu1 %v6282_v40 }
 0xdf7   : > { %4978 = vmatprep.subr.mxu1 %v6286_v41 }
 0xdf8   : > { %4979 = vmatpush3.msra.mxu1 %v6286_v41 }
 0xdf9   : > { %4980 = vmatprep.subr.mxu1 %v6290_v24 }
 0xdfa   : > { %4981 = vmatpush3.msra.mxu1 %v6290_v24 }
 0xdfb   : > { %4982 = vmatprep.subr.mxu1 %v6294_v30 }
 0xdfc   : > { %4983 = vmatpush3.msra.mxu1 %v6294_v30 }
 0xdfd   : > { %4984 = vmatprep.subr.mxu1 %v6298_v42 }
 0xdfe   : > { %4985 = vmatpush3.msra.mxu1 %v6298_v42 }
 0xdff   : > { %4986 = vmatprep.subr.mxu1 %v6302_v43 }
 0xe00   : > { %4987 = vmatpush3.msra.mxu1 %v6302_v43 }
 0xe01   : > { %4988 = vmatprep.subr.mxu1 %v6306_v25 }
 0xe02   : > { %4989 = vmatpush3.msra.mxu1 %v6306_v25 }
 0xe03   : > { %4990 = vmatprep.subr.mxu1 %v6313_v44 }
 0xe04   : > { %4991 = vmatpush3.msra.mxu1 %v6313_v44 }
 0xe05   : > { %4993 = vmatmul.mubr.f32.vlgmr.msra.gmra.mxu1 %v6553_v26 }
 0xe06   : > { %5041 = vmatprep.mubr.msk.f32.mxu1 %vm434_vm0, %v6318_v45 }
 0xea5   : > { %v4959_v59 = vpop.f32.mrf.mxu1 }
 0xea6   : > { %v2781_v62 = vsub.f32 %v4959_v59, %v2775_v49  ;;  %v3139_v49 = vmul.f32 %v6553_v26, %v6553_v26 }
 0xea7   : > { %v2761_v63 = vpop.f32.mrf.mxu1 }
 0xea8   : > { %v2787_v22 = vmul.f32 2.0, %v2781_v62  ;;  %v2780_v51 = vsub.f32 %v2761_v63, %v2774_v53 }
 0xeaa   : > { %v2789_v23 = vadd.f32 0.0009, %v2787_v22  ;;  %v2786_v0 = vmul.f32 2.0, %v2780_v51  ;;  %v3442_v22 = vmul.f32 %v6568_v13, %v6517_v4 }
 0xeac   : > { %v2791_v47 = vmul.f32 %v2789_v23, %v2785_v32  ;;  %v2788_v52 = vadd.f32 0.0009, %v2786_v0 }
 0xeae   : > { %v2811_v58 = vmul.f32 %v2809_v55, %v2791_v47  ;;  %v2790_v48 = vmul.f32 %v2788_v52, %v2784_v31  ;;  %v5283_v47 = vld [vmem:[%s5729_s2] sm:$0xff] }
 0xeaf   : > { %v5284_v55 = vld [vmem:[%s5736_s17] sm:$0xff] }
 0xeb0   : > { %v2810_v1 = vmul.f32 %v2808_v56, %v2790_v48  ;;  %v347_v52 = vsub.f32 %v5283_v47, %v5284_v55  ;;  %v5286_v48 = vld [vmem:[%s5736_s17 + $0x8] sm:$0xff] }
 0xeb2   : > { %v2812_v2 = vadd.f32 %v2811_v58, %v2810_v1  ;;  %v5285_v58 = vld [vmem:[%s5729_s2 + $0x8] sm:$0xff]  ;;  %v5287_v1 = vld [vmem:[%s5729_s2 + $0x10] sm:$0xff] }
 0xeb3   : > { %v348_v56 = vsub.f32 %v5285_v58, %v5286_v48 }
 0xeb4   : > { %v2813_v3 = vrot.slane %v2812_v2, 4 }
 0xeb6   : > { %v2814_v5 = vadd.f32 %v2813_v3, %v2812_v2  ;;  %v5288_v2 = vld [vmem:[%s5736_s17 + $0x10] sm:$0xff] }
 0xeb7   : > { %v1178_v3 = vsub.f32 %v5287_v1, %v5288_v2 }
 0xeb8   : > { %v2815_v6 = vrot.slane %v2814_v5, 2 }
 0xeba   : > { %v2816_v7 = vadd.f32 %v2815_v6, %v2814_v5  ;;  %v5289_v5 = vld [vmem:[%s5729_s2 + $0x18] sm:$0xff] }
 0xebb   : > { %v5290_v6 = vld [vmem:[%s5736_s17 + $0x18] sm:$0xff] }
 0xebc   : > { %v2817_v8 = vrot.slane %v2816_v7, 1 }
 0xebe   : > { %v2818_v9 = vadd.f32 %v2817_v8, %v2816_v7  ;;  %v1179_v7 = vsub.f32 %v5289_v5, %v5290_v6  ;;  %v349_v8 = vand.u32 2147483647, %v347_v52 }
 0xec0   : > { %v6565_v10 = vadd.f32 %v2818_v9, %v6332_v17  ;;  %v6604_v17 = vld [vmem:[%s5736_s17 + $0x38] sm:$0xff]  ;;  %v350_v9 = vand.u32 2147483647, %v348_v56 }
 0xec1   : > { %v3291_v61 = vmul.f32 %v6604_v17, %v6604_v17 }
 0xec5   : > { %v4994_v11 = vpop.f32.mrf.mxu1 }
 0xec6   : > { %4995 = vmatprep.subr.mxu0 %v4994_v11 }
 0xec7   : > { %v2904_v12 = vpop.f32.mrf.mxu1  ;;  %4996 = vmatpush3.msra.mxu0 %v4994_v11  ;;  %v1180_v11 = vand.u32 2147483647, %v1178_v3 }
 0xec8   : > { %4997 = vmatprep.subr.mxu0 %v2904_v12 }
 0xec9   : > { %4998 = vmatpush3.msra.mxu0 %v2904_v12  ;;  %v1181_v12 = vand.u32 2147483647, %v1179_v7 }
 0xeca   : > { %5000 = vmatmul.mubr.msk.f32.vlgmr.msra.gmra.mxu0 %vm434_vm0, %v6337_v28  ;;  %5002 = vmatprep.subr.mxu0 %v6249_v33 }
 0xecb   : > { %5003 = vmatpush3.msra.mxu0 %v6249_v33  ;;  %5034 = vmatprep.mubr.f32.mxu0 %v6568_v13 }
 0xecc   : > { %5004 = vmatprep.subr.mxu0 %v6254_v34 }
 0xecd   : > { %5005 = vmatpush3.msra.mxu0 %v6254_v34 }
 0xece   : > { %5006 = vmatprep.subr.mxu0 %v6258_v35 }
 0xecf   : > { %5007 = vmatpush3.msra.mxu0 %v6258_v35 }
 0xed0   : > { %5008 = vmatprep.subr.mxu0 %v6262_v21 }
 0xed1   : > { %5009 = vmatpush3.msra.mxu0 %v6262_v21 }
 0xed2   : > { %5010 = vmatprep.subr.mxu0 %v6266_v36 }
 0xed3   : > { %5011 = vmatpush3.msra.mxu0 %v6266_v36 }
 0xed4   : > { %5012 = vmatprep.subr.mxu0 %v6270_v37 }
 0xed5   : > { %5013 = vmatpush3.msra.mxu0 %v6270_v37 }
 0xed6   : > { %5014 = vmatprep.subr.mxu0 %v6274_v38 }
 0xed7   : > { %5015 = vmatpush3.msra.mxu0 %v6274_v38 }
 0xed8   : > { %5016 = vmatprep.subr.mxu0 %v6278_v39 }
 0xed9   : > { %5017 = vmatpush3.msra.mxu0 %v6278_v39 }
 0xeda   : > { %5018 = vmatprep.subr.mxu0 %v6282_v40 }
 0xedb   : > { %5019 = vmatpush3.msra.mxu0 %v6282_v40 }
 0xedc   : > { %5020 = vmatprep.subr.mxu0 %v6286_v41 }
 0xedd   : > { %5021 = vmatpush3.msra.mxu0 %v6286_v41 }
 0xede   : > { %5022 = vmatprep.subr.mxu0 %v6290_v24 }
 0xedf   : > { %5023 = vmatpush3.msra.mxu0 %v6290_v24 }
 0xee0   : > { %5024 = vmatprep.subr.mxu0 %v6294_v30 }
 0xee1   : > { %5025 = vmatpush3.msra.mxu0 %v6294_v30 }
 0xee2   : > { %5026 = vmatprep.subr.mxu0 %v6298_v42 }
 0xee3   : > { %5027 = vmatpush3.msra.mxu0 %v6298_v42 }
 0xee4   : > { %5028 = vmatprep.subr.mxu0 %v6302_v43 }
 0xee5   : > { %5029 = vmatpush3.msra.mxu0 %v6302_v43 }
 0xee6   : > { %5030 = vmatprep.subr.mxu0 %v6306_v25 }
 0xee7   : > { %5031 = vmatpush3.msra.mxu0 %v6306_v25 }
 0xee8   : > { %5032 = vmatprep.subr.mxu0 %v6313_v44 }
 0xee9   : > { %5033 = vmatpush3.msra.mxu0 %v6313_v44 }
 0xeea   : > { %5035 = vmatmul.mubr.f32.vlgmr.msra.gmra.mxu0 %v6604_v17 }
 0xeeb   : > { %5083 = vmatprep.mubr.msk.f32.mxu0 %vm434_vm0, %v6318_v45 }
 0xf8a   : > { %v6611_v14 = vpop.f32.mrf.mxu0 }
 0xf8c   : > { %v6613_v15 = vpop.f32.mrf.mxu0 }
 0xfaa   : > { %v5036_v16 = vpop.f32.mrf.mxu0 }
 0xfab   : > { %5037 = vmatprep.subr.mxu1 %v5036_v16 }
 0xfac   : > { %v3054_v18 = vpop.f32.mrf.mxu0  ;;  %5038 = vmatpush3.msra.mxu1 %v5036_v16  ;;  %v5291_v16 = vld [vmem:[%s5729_s2 + $0x20] sm:$0xff] }
 0xfad   : > { %5039 = vmatprep.subr.mxu1 %v3054_v18 }
 0xfae   : > { %5040 = vmatpush3.msra.mxu1 %v3054_v18  ;;  %v5292_v18 = vld [vmem:[%s5729_s2 + $0x28] sm:$0xff] }
 0xfaf   : > { %5042 = vmatmul.mubr.msk.f32.vlgmr.msra.gmra.mxu1 %vm434_vm0, %v6337_v28  ;;  %5044 = vmatprep.subr.mxu1 %v6249_v33 }
 0xfb0   : > { %5045 = vmatpush3.msra.mxu1 %v6249_v33  ;;  %5076 = vmatprep.mubr.f32.mxu1 %v3138_v46  ;;  %v2003_v46 = vsub.f32 %v5292_v18, %v6373_v29 }
 0xfb1   : > { %5046 = vmatprep.subr.mxu1 %v6254_v34 }
 0xfb2   : > { %5047 = vmatpush3.msra.mxu1 %v6254_v34 }
 0xfb3   : > { %5048 = vmatprep.subr.mxu1 %v6258_v35 }
 0xfb4   : > { %5049 = vmatpush3.msra.mxu1 %v6258_v35 }
 0xfb5   : > { %5050 = vmatprep.subr.mxu1 %v6262_v21 }
 0xfb6   : > { %5051 = vmatpush3.msra.mxu1 %v6262_v21 }
 0xfb7   : > { %5052 = vmatprep.subr.mxu1 %v6266_v36 }
 0xfb8   : > { %5053 = vmatpush3.msra.mxu1 %v6266_v36 }
 0xfb9   : > { %5054 = vmatprep.subr.mxu1 %v6270_v37 }
 0xfba   : > { %5055 = vmatpush3.msra.mxu1 %v6270_v37 }
 0xfbb   : > { %5056 = vmatprep.subr.mxu1 %v6274_v38 }
 0xfbc   : > { %5057 = vmatpush3.msra.mxu1 %v6274_v38 }
 0xfbd   : > { %5058 = vmatprep.subr.mxu1 %v6278_v39 }
 0xfbe   : > { %5059 = vmatpush3.msra.mxu1 %v6278_v39 }
 0xfbf   : > { %5060 = vmatprep.subr.mxu1 %v6282_v40 }
 0xfc0   : > { %5061 = vmatpush3.msra.mxu1 %v6282_v40 }
 0xfc1   : > { %5062 = vmatprep.subr.mxu1 %v6286_v41 }
 0xfc2   : > { %5063 = vmatpush3.msra.mxu1 %v6286_v41 }
 0xfc3   : > { %5064 = vmatprep.subr.mxu1 %v6290_v24 }
 0xfc4   : > { %5065 = vmatpush3.msra.mxu1 %v6290_v24 }
 0xfc5   : > { %5066 = vmatprep.subr.mxu1 %v6294_v30 }
 0xfc6   : > { %5067 = vmatpush3.msra.mxu1 %v6294_v30 }
 0xfc7   : > { %5068 = vmatprep.subr.mxu1 %v6298_v42 }
 0xfc8   : > { %5069 = vmatpush3.msra.mxu1 %v6298_v42 }
 0xfc9   : > { %5070 = vmatprep.subr.mxu1 %v6302_v43 }
 0xfca   : > { %5071 = vmatpush3.msra.mxu1 %v6302_v43 }
 0xfcb   : > { %5072 = vmatprep.subr.mxu1 %v6306_v25 }
 0xfcc   : > { %5073 = vmatpush3.msra.mxu1 %v6306_v25 }
 0xfcd   : > { %5074 = vmatprep.subr.mxu1 %v6313_v44 }
 0xfce   : > { %5075 = vmatpush3.msra.mxu1 %v6313_v44 }
 0xfcf   : > { %5077 = vmatmul.mubr.f32.vlgmr.msra.gmra.mxu1 %v3139_v49  ;;  %v351_v49 = vadd.f32 %v350_v9, %v349_v8 }
 0xfd0   : > { %5125 = vmatprep.mubr.msk.f32.mxu1 %vm434_vm0, %v6318_v45 }
0x106f   : > { %v6655_v50 = vpop.f32.mrf.mxu1 }
0x1071   : > { %v6657_v53 = vpop.f32.mrf.mxu1 }
0x108f   : > { %v5078_v54 = vpop.f32.mrf.mxu1 }
0x1090   : > { %5079 = vmatprep.subr.mxu0 %v5078_v54 }
0x1091   : > { %v3206_v59 = vpop.f32.mrf.mxu1  ;;  %5080 = vmatpush3.msra.mxu0 %v5078_v54  ;;  %v1182_v54 = vadd.f32 %v1181_v12, %v1180_v11 }
0x1092   : > { %5081 = vmatprep.subr.mxu0 %v3206_v59 }
0x1093   : > { %5082 = vmatpush3.msra.mxu0 %v3206_v59 }
0x1094   : > { %5084 = vmatmul.mubr.msk.f32.vlgmr.msra.gmra.mxu0 %vm434_vm0, %v6337_v28  ;;  %5086 = vmatprep.subr.mxu0 %v6249_v33 }
0x1095   : > { %5087 = vmatpush3.msra.mxu0 %v6249_v33  ;;  %5118 = vmatprep.mubr.f32.mxu0 %v3290_v60  ;;  %v2005_v60 = vand.u32 2147483647, %v2003_v46 }
0x1096   : > { %5088 = vmatprep.subr.mxu0 %v6254_v34 }
0x1097   : > { %5089 = vmatpush3.msra.mxu0 %v6254_v34 }
0x1098   : > { %5090 = vmatprep.subr.mxu0 %v6258_v35 }
0x1099   : > { %5091 = vmatpush3.msra.mxu0 %v6258_v35 }
0x109a   : > { %5092 = vmatprep.subr.mxu0 %v6262_v21 }
0x109b   : > { %5093 = vmatpush3.msra.mxu0 %v6262_v21 }
0x109c   : > { %5094 = vmatprep.subr.mxu0 %v6266_v36 }
0x109d   : > { %5095 = vmatpush3.msra.mxu0 %v6266_v36 }
0x109e   : > { %5096 = vmatprep.subr.mxu0 %v6270_v37 }
0x109f   : > { %5097 = vmatpush3.msra.mxu0 %v6270_v37 }
0x10a0   : > { %5098 = vmatprep.subr.mxu0 %v6274_v38 }
0x10a1   : > { %5099 = vmatpush3.msra.mxu0 %v6274_v38 }
0x10a2   : > { %5100 = vmatprep.subr.mxu0 %v6278_v39 }
0x10a3   : > { %5101 = vmatpush3.msra.mxu0 %v6278_v39 }
0x10a4   : > { %5102 = vmatprep.subr.mxu0 %v6282_v40 }
0x10a5   : > { %5103 = vmatpush3.msra.mxu0 %v6282_v40 }
0x10a6   : > { %5104 = vmatprep.subr.mxu0 %v6286_v41 }
0x10a7   : > { %5105 = vmatpush3.msra.mxu0 %v6286_v41 }
0x10a8   : > { %5106 = vmatprep.subr.mxu0 %v6290_v24 }
0x10a9   : > { %5107 = vmatpush3.msra.mxu0 %v6290_v24 }
0x10aa   : > { %5108 = vmatprep.subr.mxu0 %v6294_v30 }
0x10ab   : > { %5109 = vmatpush3.msra.mxu0 %v6294_v30 }
0x10ac   : > { %5110 = vmatprep.subr.mxu0 %v6298_v42 }
0x10ad   : > { %5111 = vmatpush3.msra.mxu0 %v6298_v42 }
0x10ae   : > { %5112 = vmatprep.subr.mxu0 %v6302_v43 }
0x10af   : > { %5113 = vmatpush3.msra.mxu0 %v6302_v43 }
0x10b0   : > { %5114 = vmatprep.subr.mxu0 %v6306_v25 }
0x10b1   : > { %5115 = vmatpush3.msra.mxu0 %v6306_v25 }
0x10b2   : > { %5116 = vmatprep.subr.mxu0 %v6313_v44 }
0x10b3   : > { %5117 = vmatpush3.msra.mxu0 %v6313_v44 }
0x10b4   : > { %5119 = vmatmul.mubr.f32.vlgmr.msra.gmra.mxu0 %v3291_v61  ;;  %v2826_v61 = vsub.f32 %v6517_v4, %v6568_v13 }
0x10b5   : > { %5167 = vmatprep.mubr.msk.f32.mxu0 %vm434_vm0, %v6318_v45 }
0x1154   : > { %v5085_v62 = vpop.f32.mrf.mxu0 }
0x1156   : > { %v3281_v63 = vpop.f32.mrf.mxu0 }
0x1174   : > { %v5120_v19 = vpop.f32.mrf.mxu0 }
0x1175   : > { %5121 = vmatprep.subr.mxu1 %v5120_v19 }
0x1176   : > { %v3358_v20 = vpop.f32.mrf.mxu0  ;;  %5122 = vmatpush3.msra.mxu1 %v5120_v19  ;;  %v1183_v19 = vrot.slane %v1182_v54, 4 }
0x1177   : > { %5123 = vmatprep.subr.mxu1 %v3358_v20 }
0x1178   : > { %5124 = vmatpush3.msra.mxu1 %v3358_v20 }
0x1179   : > { %5126 = vmatmul.mubr.msk.f32.vlgmr.msra.gmra.mxu1 %vm434_vm0, %v6337_v28  ;;  %5128 = vmatprep.subr.mxu1 %v6249_v33 }
0x117a   : > { %5129 = vmatpush3.msra.mxu1 %v6249_v33  ;;  %5160 = vmatprep.mubr.f32.mxu1 %v3442_v22  ;;  %v3443_v33 = vmul.f32 %v6604_v17, %v6553_v26  ;;  %v2828_v22 = vand.u32 2147483647, %v2826_v61 }
0x117b   : > { %5130 = vmatprep.subr.mxu1 %v6254_v34 }
0x117c   : > { %5131 = vmatpush3.msra.mxu1 %v6254_v34  ;;  %v3597_v34 = vmul.f32 %v6655_v50, %v6655_v50 }
0x117d   : > { %5132 = vmatprep.subr.mxu1 %v6258_v35 }
0x117e   : > { %5133 = vmatpush3.msra.mxu1 %v6258_v35  ;;  %v3595_v35 = vmul.f32 %v6611_v14, %v6611_v14 }
0x117f   : > { %5134 = vmatprep.subr.mxu1 %v6262_v21 }
0x1180   : > { %5135 = vmatpush3.msra.mxu1 %v6262_v21  ;;  %v3596_v21 = vmul.f32 %v6657_v53, %v6657_v53 }
0x1181   : > { %5136 = vmatprep.subr.mxu1 %v6266_v36 }
0x1182   : > { %5137 = vmatpush3.msra.mxu1 %v6266_v36 }
0x1183   : > { %5138 = vmatprep.subr.mxu1 %v6270_v37 }
0x1184   : > { %5139 = vmatpush3.msra.mxu1 %v6270_v37  ;;  %v3594_v37 = vmul.f32 %v6613_v15, %v6613_v15 }
0x1185   : > { %5140 = vmatprep.subr.mxu1 %v6274_v38 }
0x1186   : > { %5141 = vmatpush3.msra.mxu1 %v6274_v38  ;;  %v3617_v38 = vadd.f32 %v3597_v34, %v3595_v35 }
0x1187   : > { %5142 = vmatprep.subr.mxu1 %v6278_v39 }
0x1188   : > { %5143 = vmatpush3.msra.mxu1 %v6278_v39  ;;  %v3601_v39 = vsub.f32 %v5085_v62, %v3595_v35  ;;  %v2827_v62 = vsub.f32 %v6553_v26, %v6604_v17 }
0x1189   : > { %5144 = vmatprep.subr.mxu1 %v6282_v40 }
0x118a   : > { %5145 = vmatpush3.msra.mxu1 %v6282_v40 }
0x118b   : > { %5146 = vmatprep.subr.mxu1 %v6286_v41 }
0x118c   : > { %5147 = vmatpush3.msra.mxu1 %v6286_v41 }
0x118d   : > { %5148 = vmatprep.subr.mxu1 %v6290_v24 }
0x118e   : > { %5149 = vmatpush3.msra.mxu1 %v6290_v24  ;;  %v3616_v24 = vadd.f32 %v3596_v21, %v3594_v37 }
0x118f   : > { %5150 = vmatprep.subr.mxu1 %v6294_v30 }
0x1190   : > { %5151 = vmatpush3.msra.mxu1 %v6294_v30  ;;  %v3600_v30 = vsub.f32 %v3281_v63, %v3594_v37  ;;  %v3618_v51 = vadd.f32 0.0001, %v3616_v24  ;;  %v352_v63 = vrot.slane %v351_v49, 4 }
0x1191   : > { %5152 = vmatprep.subr.mxu1 %v6298_v42 }
0x1192   : > { %5153 = vmatpush3.msra.mxu1 %v6298_v42 }
0x1193   : > { %5154 = vmatprep.subr.mxu1 %v6302_v43 }
0x1194   : > { %5155 = vmatpush3.msra.mxu1 %v6302_v43 }
0x1195   : > { %5156 = vmatprep.subr.mxu1 %v6306_v25 }
0x1196   : > { %5157 = vmatpush3.msra.mxu1 %v6306_v25  ;;  %v3619_v25 = vadd.f32 0.0001, %v3617_v38 }
0x1197   : > { %5158 = vmatprep.subr.mxu1 %v6313_v44 }
0x1198   : > { %5159 = vmatpush3.msra.mxu1 %v6313_v44 }
0x1199   : > { %5161 = vmatmul.mubr.f32.vlgmr.msra.gmra.mxu1 %v3443_v33  ;;  %v2829_v33 = vand.u32 2147483647, %v2827_v62 }
0x1239   : > { %v5127_v36 = vpop.f32.mrf.mxu1 }
0x123a   : > { %v3603_v40 = vsub.f32 %v5127_v36, %v3597_v34  ;;  %v353_v34 = vadd.f32 %v352_v63, %v351_v49 }
0x123b   : > { %v3433_v41 = vpop.f32.mrf.mxu1 }
0x123c   : > { %v3621_v42 = vadd.f32 %v3603_v40, %v3601_v39  ;;  %v3602_v43 = vsub.f32 %v3433_v41, %v3596_v21  ;;  %v2830_v21 = vadd.f32 %v2829_v33, %v2828_v22  ;;  %v354_v29 = vrot.slane %v353_v34, 2 }
0x123e   : > { %v3623_v44 = vadd.f32 0.0009, %v3621_v42  ;;  %v3620_v45 = vadd.f32 %v3602_v43, %v3600_v30  ;;  %v2831_v38 = vrot.slane %v2830_v21, 4  ;;  %v355_v39 = vadd.f32 %v354_v29, %v353_v34 }
0x1240   : > { %v6745_v32 = vmul.f32 %v3623_v44, %v3619_v25  ;;  %v3622_v57 = vadd.f32 0.0009, %v3620_v45  ;;  %v2832_v40 = vadd.f32 %v2831_v38, %v2830_v21  ;;  %v356_v26 = vrot.slane %v355_v39, 1 }
0x1242   : > { %v6747_v23 = vmul.f32 %v3622_v57, %v3618_v51  ;;  %v2833_v24 = vrot.slane %v2832_v40, 2  ;;  %v357_v30 = vadd.f32 %v356_v26, %v355_v39 }
0x1244   : > { %v2834_v25 = vadd.f32 %v2833_v24, %v2832_v40 }
0x1246   : > { %v2835_v51 = vrot.slane %v2834_v25, 1 }
0x1259   : > { %v5162_v0 = vpop.f32.mrf.mxu1 }
0x125a   : > { %5163 = vmatprep.subr.mxu0 %v5162_v0 }
0x125b   : > { %v3510_v31 = vpop.f32.mrf.mxu1  ;;  %5164 = vmatpush3.msra.mxu0 %v5162_v0  ;;  %v2836_v0 = vadd.f32 %v2835_v51, %v2834_v25 }
0x125c   : > { %5165 = vmatprep.subr.mxu0 %v3510_v31 }
0x125d   : > { %5166 = vmatpush3.msra.mxu0 %v3510_v31 }
0x125e   : > { %5168 = vmatmul.mubr.msk.f32.vlgmr.msra.gmra.mxu0 %vm434_vm0, %v6337_v28  ;;  %v2002_v28 = vsub.f32 %v5291_v16, %v6335_v27  ;;  %v1184_v27 = vadd.f32 %v1183_v19, %v1182_v54 }
0x1260   : > { %v2004_v59 = vand.u32 2147483647, %v2002_v28  ;;  %v1185_v36 = vrot.slane %v1184_v27, 2 }
0x1262   : > { %v2006_v20 = vadd.f32 %v2005_v60, %v2004_v59  ;;  %v1186_v4 = vadd.f32 %v1185_v36, %v1184_v27 }
0x1264   : > { %v2007_v35 = vrot.slane %v2006_v20, 4  ;;  %v1187_v17 = vrot.slane %v1186_v4, 1 }
0x1266   : > { %v2008_v37 = vadd.f32 %v2007_v35, %v2006_v20  ;;  %v1188_v42 = vadd.f32 %v1187_v17, %v1186_v4 }
0x1268   : > { %v2009_v13 = vrot.slane %v2008_v37, 2  ;;  %v1189_v44 = vadd.f32 %v1188_v42, %v357_v30 }
0x126a   : > { %v2010_v41 = vadd.f32 %v2009_v13, %v2008_v37 }
0x126c   : > { %v2011_v43 = vrot.slane %v2010_v41, 1 }
0x126e   : > { %v2012_v45 = vadd.f32 %v2011_v43, %v2010_v41 }
0x1270   : > { %v2013_v57 = vadd.f32 %v2012_v45, %v1189_v44 }
0x1272   : > { %v2837_v31 = vadd.f32 %v2836_v0, %v2013_v57 }
0x1274   : > { %3644 = vst [vmem:[%s316_s7] sm:$0x1] %v2837_v31 }
0x1275   : > { %5414 = shalt.err (!%p5411_p4)
}
0x1276   : > { %s5415_s30 = scalar_lea.hbm %s3661_s29, 16  ;;  %s5419_s13 = scalar_lea.hbm %s6837_s4, 32 }
0x1277   : > { %p5416_p5 = scmp.ne.s32.totalorder %s3661_s29, %s5415_s30  ;;  %p5420_p2 = scmp.lt.s32.totalorder %s3661_s29, %s6837_s4 }
0x1278   : > { %p5421_p6 = scmp.lt.s32.totalorder %s5419_s13, %s5415_s30 }
0x1279   : > { %p5417_p7 = pnand %p5416_p5, %p6863_p10 }
0x127a   : > { %p5422_p12 = por %p5421_p6, %p5420_p2 }
0x127b   : > { %p5418_p8 = pneg %p5417_p7 }
0x127d   : > { %p5423_p0 = pnand %p5422_p12, %p5418_p8 }
0x127f   : > { %5426 = shalt.err (!%p5423_p0)
}
0x1280   : > { %5182 = dma.vmem_to_hbm [thread:$0]  (%p6863_p10), %s3664_s9, 16, %s3661_s29, %s3647_s6   ;;  %5261 = vrcp.f32 %v6745_v32  ;;  %v3599_v55 = vmul.f32 %v6655_v50, %v6611_v14  ;;  %v3598_v58 = vmul.f32 %v6657_v53, %v6613_v15 }
0x1281   : > { %5263 = vrcp.f32 %v6747_v23  ;;  %s322_s7 = scalar_lea.vmem [#allocation11], %s5725_s0  ;;  %s3674_s29 = scalar_lea.hbm %s6838_s5, %s3882_s24 }
0x1282   : > { %v3607_v1 = vmul.f32 2.0, %v3599_v55  ;;  %v3606_v6 = vmul.f32 2.0, %v3598_v58  ;;  %s3676_s9 = sshll.u32 %s322_s7, 4  ;;  %s3651_s6 = scalar_lea.sflag [#allocation12], %s5725_s0  ;;  %s3677_s9 = int_to_ptr.vmem [resolvable:$true] %s3676_s9 }
0x1283   : > { %s5427_s8 = scalar_lea.vmem %s3677_s9, 16  ;;  %s5516_s10 = smov [#allocation11]  }
0x1284   : > { %v3609_v11 = vadd.f32 0.0001, %v3607_v1  ;;  %v3608_v50 = vadd.f32 0.0001, %v3606_v6  ;;  %p5428_p3 = scmp.ne.s32.totalorder %s3677_s9, %s5427_s8  ;;  %s5431_s12 = sshll.u32 %s5516_s10, 4  ;;  %s5432_s12 = int_to_ptr.vmem [resolvable:$false] %s5431_s12 }
0x1285   : > { %s5433_s14 = scalar_lea.vmem %s5432_s12, 32  ;;  %p5434_p13 = scmp.lt.s32.totalorder %s3677_s9, %s5432_s12 }
0x1286   : > { %p5429_p11 = pnand %p5428_p3, %p6863_p10  ;;  %p5435_p1 = scmp.lt.s32.totalorder %s5433_s14, %s5427_s8 }
0x1288   : > { %p5430_p9 = pneg %p5429_p11  ;;  %p5436_p4 = por %p5435_p1, %p5434_p13 }
0x128a   : > { %p5437_p5 = pnand %p5436_p4, %p5430_p9 }
0x128d   : > { %v5262_v47 = vpop.eup %5261 }
0x128e   : > { %v5264_v52 = vpop.eup %5263  ;;  %v3629_v48 = vmul.f32 %v5262_v47, %v6745_v32 }
0x128f   : > { %v3628_v2 = vmul.f32 %v5264_v52, %v6747_v23 }
0x1290   : > { %v3631_v7 = vsub.f32 2.0, %v3629_v48 }
0x1291   : > { %v3630_v12 = vsub.f32 2.0, %v3628_v2 }
0x1292   : > { %v3633_v15 = vmul.f32 %v5262_v47, %v3631_v7 }
0x1293   : > { %v3632_v23 = vmul.f32 %v5264_v52, %v3630_v12 }
0x131e   : > { %v5169_v56 = vpop.f32.mrf.mxu0 }
0x131f   : > { %v3605_v3 = vsub.f32 %v5169_v56, %v3599_v55 }
0x1320   : > { %v3585_v5 = vpop.f32.mrf.mxu0 }
0x1321   : > { %v3611_v8 = vmul.f32 2.0, %v3605_v3  ;;  %v3604_v9 = vsub.f32 %v3585_v5, %v3598_v58 }
0x1323   : > { %v3613_v16 = vadd.f32 0.0009, %v3611_v8  ;;  %v3610_v14 = vmul.f32 2.0, %v3604_v9 }
0x1325   : > { %v3615_v28 = vmul.f32 %v3613_v16, %v3609_v11  ;;  %v3612_v53 = vadd.f32 0.0009, %v3610_v14 }
0x1327   : > { %v3635_v32 = vmul.f32 %v3633_v15, %v3615_v28  ;;  %v3614_v18 = vmul.f32 %v3612_v53, %v3608_v50 }
0x1329   : > { %v3634_v46 = vmul.f32 %v3632_v23, %v3614_v18 }
0x132b   : > { %v3636_v49 = vadd.f32 %v3635_v32, %v3634_v46 }
0x132d   : > { %v3637_v54 = vrot.slane %v3636_v49, 4 }
0x132f   : > { %v3638_v59 = vadd.f32 %v3637_v54, %v3636_v49 }
0x1331   : > { %v3639_v60 = vrot.slane %v3638_v59, 2 }
0x1333   : > { %v3640_v61 = vadd.f32 %v3639_v60, %v3638_v59 }
0x1335   : > { %v3641_v62 = vrot.slane %v3640_v61, 1 }
0x1337   : > { %v3642_v63 = vadd.f32 %v3641_v62, %v3640_v61 }
0x1339   : > { %v3643_v19 = vadd.f32 %v3642_v63, %v6565_v10 }
0x133b   : > { %3645 = vst [vmem:[%s322_s7] sm:$0x1] %v3643_v19 }
0x133c   : > { %5440 = shalt.err (!%p5437_p5)
}
0x133d   : > { %s5441_s22 = scalar_lea.hbm %s3674_s29, 16  ;;  %s5445_s30 = scalar_lea.hbm %s6838_s5, 32 }
0x133e   : > { %p5442_p7 = scmp.ne.s32.totalorder %s3674_s29, %s5441_s22  ;;  %p5446_p6 = scmp.lt.s32.totalorder %s3674_s29, %s6838_s5 }
0x133f   : > { %p5447_p12 = scmp.lt.s32.totalorder %s5445_s30, %s5441_s22 }
0x1340   : > { %p5443_p8 = pnand %p5442_p7, %p6863_p10 }
0x1341   : > { %p5448_p0 = por %p5447_p12, %p5446_p6 }
0x1342   : > { %p5444_p2 = pneg %p5443_p8 }
0x1344   : > { %p5449_p3 = pnand %p5448_p0, %p5444_p2 }
0x1346   : > { %5452 = shalt.err (!%p5449_p3)
}
0x1347   : > { %5183 = dma.vmem_to_hbm [thread:$0]  (%p6863_p10), %s3677_s9, 16, %s3674_s29, %s3651_s6  }
0x1348 PF: > { %s3688_s13 = sand.u32 1, %s5495_s18   ;;  %p6864_p11 = scmp.ne.s32.totalorder %s6849_s25, 0 }
0x1349   : > { %p6865_p9 = scmp.ge.s32.totalorder %s5507_s21, 2  ;;  %s3689_s26 = scalar_lea.sflag [#allocation4], %s3688_s13 }
0x134b   : > { %p5201_p13 = pnand %p6865_p9, %p6864_p11 }
0x134d   : > { %p5202_p1 = pneg %p5201_p13 }
0x134f   : > { %5486 = dma.done.wait (%p5202_p1), %s3689_s26, 16  }
0x1350   : > { %5488 = vsyncadd (%p5202_p1), %s3689_s26, 4294967280  ;;  %s3697_s17 = scalar_lea.sflag [#allocation12], %s3688_s13 }
0x1351   : > { %5490 = dma.done.wait (%p5202_p1), %s3697_s17, 16  }
0x1352   : > { %5492 = vsyncadd (%p5202_p1), %s3697_s17, 4294967280  ;;  %p26_p10 = scmp.ge.s32.totalorder %s5625_s15, 4   ;;  %s6866_s18 = smov %s5499_s19 }
0x1353   : > { %s6867_s19 = smov %s5503_s20  ;;  %s6868_s20 = smov %s5641_s27 }
0x1354   : > { %s6869_s21 = smov %s5625_s15  ;;  %28 = sbr.rel (!%p26_p10) target bundleno = 13 (0xd), region = 125 }
0x1359   :  { %3701 = vsyncpa [#allocation3], 1 }
0x135a   :  { %3703 = vsyncpa [#allocation3 + $0x1], 1 }
0x135b   :  { %3704 = vsyncpa [#allocation6], 1 }
0x135c   :  { %3706 = vsyncpa [#allocation6 + $0x1], 1 }
0x135d   :  { %3707 = vsyncpa [#allocation9], 1 }
0x135e   :  { %3708 = vsyncpa [#allocation4], 1 }
0x135f   :  { %3710 = vsyncpa [#allocation4 + $0x1], 1 }
0x1360   :  { %3711 = vsyncpa [#allocation12], 1 }
0x1361   :  { %3713 = vsyncpa [#allocation12 + $0x1], 1 }

</bundles_post_ra>
